<compile_context>
chip_gen: v7x
topology: tpu7x:2x2x1
jax: 0.10.0
libtpu: 0.0.40
codegen_flags: <defaults>
</compile_context>

<pallas_src>
import functools

import jax
import jax.numpy as jnp
from jax import lax
from jax.experimental import pallas as pl
from jax.experimental.pallas import tpu as pltpu


_BN_EPS = 1e-5


# ----------------------------------------------------------------------------
# VMEM-aware tiling helpers.
# ----------------------------------------------------------------------------
def _vmem_capacity_bytes():
    """Physical VMEM per TensorCore (fallback = v7x's 64 MiB, the smallest)."""
    try:
        return int(pltpu.get_tpu_info().vmem_capacity_bytes)
    except Exception:
        return 64 * 1024 * 1024


def _pick_tile_n(n, row_bytes, budget_bytes):
    """Largest N-tile (multiple of 8, dividing N) whose x block fits budget."""
    if n * row_bytes <= budget_bytes:
        return n
    cap = max(8, (budget_bytes // row_bytes) // 8 * 8)
    t = min(cap, (n // 8) * 8)
    while t >= 8:
        if n % t == 0:
            return t
        t -= 8
    return n  # no aligned divisor found: fall back to a single tile


# ----------------------------------------------------------------------------
# Kernel A: attention-weighted aggregation over S + first Linear, fused.
# ----------------------------------------------------------------------------
def _attn_linear0_kernel(x_ref, wbig_ref, w0t_ref, b0_ref, battn_ref, out_ref,
                         *, S, D):
    # x_ref:     (TN, S*D)  lane-dense input slab (f32 or bf16)
    # wbig_ref:  (S*D, S)   block-diagonal attention weight (w_attn per block)
    # w0t_ref:   (D, H)     first Linear weight, pre-transposed to (IN, OUT)
    # b0_ref:    (1, H)     first Linear bias (f32)
    # battn_ref: (1, 1)     attention bias scalar, lives in SMEM
    # out_ref:   (TN, H)    pre-activation output of the first Linear (f32)
    x = x_ref[...]

    # --- attention logits on the MXU: (TN, S*D) @ (S*D, S) -> (TN, S) -------
    logits = lax.dot_general(x, wbig_ref[...], (((1,), (0,)), ((), ())),
                             preferred_element_type=jnp.float32)
    logits = logits + battn_ref[0, 0]

    # --- softmax over S (f32) ------------------------------------------------
    m = jnp.max(logits, axis=1, keepdims=True)
    p = jnp.exp(logits - m)
    denom = jnp.sum(p, axis=1, keepdims=True)
    # NOTE: pl.reciprocal(denom, approx=True) would push this divide onto the
    # EUP, but denom is only (TN, 1) so it is not a bottleneck and the exact
    # divide keeps the tight numerical check in __main__.
    score = p / denom                                       # (TN, S) f32

    # --- agg[n, d] = sum_s score[n, s] * x[n, s*D + d] -----------------------
    # S is tiny; unrolled VPU FMAs on (TN, D) slabs -- no (TN, S, D) temporary
    # and no lane->sublane relayout of `score`.
    agg = score[:, 0:1] * x[:, 0:D]
    for si in range(1, S):
        agg = agg + score[:, si:si + 1] * x[:, si * D:(si + 1) * D]

    # --- first Linear on the MXU: (TN, D) @ (D, H) ---------------------------
    h = lax.dot_general(agg.astype(w0t_ref.dtype), w0t_ref[...],
                        (((1,), (0,)), ((), ())),
                        preferred_element_type=jnp.float32)
    out_ref[...] = (h + b0_ref[...]).astype(out_ref.dtype)


def attention_linear0(x, w_attn, b_attn, w0, b0, *, matmul_dtype=jnp.float32,
                      tile_n=None):
    """Fused attention aggregation + first Linear.  Returns (N, H) f32."""
    n, s, d = x.shape
    h = w0.shape[0]

    x2 = x.reshape(n, s * d).astype(matmul_dtype)           # lane-dense slab
    # Block-diagonal attention weight: wbig[si*D + di, t] = w_attn[di]*(si==t)
    w_flat = w_attn.reshape(d).astype(jnp.float32)
    wbig = (w_flat[None, :, None] *
            jnp.eye(s, dtype=jnp.float32)[:, None, :]).reshape(s * d, s)
    wbig = wbig.astype(matmul_dtype)
    w0t = w0.T.astype(matmul_dtype)                         # (D, H) pre-transposed
    b0_2 = b0.reshape(1, h).astype(jnp.float32)
    battn = jnp.asarray(b_attn, jnp.float32).reshape(1, 1)

    vmem_cap = _vmem_capacity_bytes()
    row_bytes = s * d * jnp.dtype(matmul_dtype).itemsize
    if tile_n is None:
        # double-buffered x block must stay well inside scoped VMEM on every
        # generation (v7x: 64 MiB physical) -> ~1/8 of physical per block.
        tile_n = _pick_tile_n(n, row_bytes, vmem_cap // 8)
    assert n % tile_n == 0

    return pl.pallas_call(
        functools.partial(_attn_linear0_kernel, S=s, D=d),
        out_shape=jax.ShapeDtypeStruct((n, h), jnp.float32),
        grid=(n // tile_n,),
        in_specs=[
            pl.BlockSpec((tile_n, s * d), lambda i: (i, 0)),
            pl.BlockSpec((s * d, s), lambda i: (0, 0)),
            pl.BlockSpec((d, h), lambda i: (0, 0)),
            pl.BlockSpec((1, h), lambda i: (0, 0)),
            pl.BlockSpec(memory_space=pltpu.MemorySpace.SMEM),   # scalar bias
        ],
        out_specs=pl.BlockSpec((tile_n, h), lambda i: (i, 0)),
        compiler_params=pltpu.CompilerParams(
            dimension_semantics=("parallel",),
            vmem_limit_bytes=min(vmem_cap // 2, 128 * 1024 * 1024),
        ),
    )(x2, wbig, w0t, b0_2, battn)


# ----------------------------------------------------------------------------
# Kernel B: fused MLP tail — BatchNorm/ReLU + remaining Linears + final Linear.
# BatchNorm uses full-batch training-mode statistics => full batch in 1 block.
# ----------------------------------------------------------------------------
def _make_mlp_tail_kernel(num_layers, relu_last, eps):
    n_mid = num_layers - 2     # hidden Linears after the first (already done)
    n_bn = num_layers - 1      # BatchNorm layers

    def kernel(*refs):
        it = iter(refs)
        h_ref = next(it)
        mids = [(next(it), next(it)) for _ in range(n_mid)]
        bns = [(next(it), next(it)) for _ in range(n_bn)]
        wl_ref, bl_ref = next(it), next(it)
        out_ref = next(it)

        def batch_norm(v, g_ref, bt_ref):
            mean = jnp.mean(v, axis=0, keepdims=True)
            var = jnp.mean(jnp.square(v - mean), axis=0, keepdims=True)
            return (v - mean) * lax.rsqrt(var + eps) * g_ref[...] + bt_ref[...]

        v = h_ref[...].astype(jnp.float32)
        for i in range(n_bn):
            if i > 0:
                wt_ref, b_ref = mids[i - 1]
                v = lax.dot_general(v, wt_ref[...], (((1,), (0,)), ((), ())),
                                    preferred_element_type=jnp.float32)
                v = v + b_ref[...]
            g_ref, bt_ref = bns[i]
            if relu_last:                       # BN then ReLU
                v = jnp.maximum(batch_norm(v, g_ref, bt_ref), 0.0)
            else:                               # ReLU then BN (module default)
                v = batch_norm(jnp.maximum(v, 0.0), g_ref, bt_ref)
            # dropout(p=0.0) => identity
            # TODO(synk): training-mode random dropout (p > 0) not implemented.
        v = lax.dot_general(v, wl_ref[...], (((1,), (0,)), ((), ())),
                            preferred_element_type=jnp.float32) + bl_ref[...]
        out_ref[...] = v.astype(out_ref.dtype)

    return kernel


def mlp_tail(h1, mid_lins, last_lin, gammas, betas, *, relu_last=False,
             eps=_BN_EPS):
    n = h1.shape[0]
    num_layers = len(mid_lins) + 2
    wl, bl = last_lin
    out_c = wl.shape[0]

    inputs = [h1]
    for w, b in mid_lins:                       # pre-transposed to (IN, OUT)
        inputs += [w.T.astype(jnp.float32), b.reshape(1, -1).astype(jnp.float32)]
    for g, bt in zip(gammas, betas):
        inputs += [g.reshape(1, -1).astype(jnp.float32),
                   bt.reshape(1, -1).astype(jnp.float32)]
    inputs += [wl.T.astype(jnp.float32), bl.reshape(1, -1).astype(jnp.float32)]

    def full_spec(a):
        nd = a.ndim
        return pl.BlockSpec(a.shape, lambda i, _nd=nd: (0,) * _nd)

    return pl.pallas_call(
        _make_mlp_tail_kernel(num_layers, relu_last, eps),
        out_shape=jax.ShapeDtypeStruct((n, out_c), jnp.float32),
        grid=(1,),     # BN batch statistics need the full batch in one block
        in_specs=[full_spec(a) for a in inputs],
        out_specs=pl.BlockSpec((n, out_c), lambda i: (0, 0)),
        compiler_params=pltpu.CompilerParams(
            dimension_semantics=("arbitrary",)),
    )(*inputs)


# ----------------------------------------------------------------------------
# Full forward pass: 2 fused pallas_calls.
# ----------------------------------------------------------------------------
def mlp_attention_forward(x, params, *, relu_last=False,
                          matmul_dtype=jnp.float32):
    """matmul_dtype=jnp.bfloat16 halves x HBM traffic / doubles MXU rate but
    rounds the big contractions to bf16; default float32 matches the PyTorch
    numerics (and the 1e-4-class check below)."""
    lins = params["lins"]
    w0, b0 = lins[0]
    h1 = attention_linear0(x, params["w_attn"], params["b_attn"], w0, b0,
                           matmul_dtype=matmul_dtype)
    return mlp_tail(h1, lins[1:-1], lins[-1], params["gammas"],
                    params["betas"], relu_last=relu_last)


# ----------------------------------------------------------------------------
# Deterministic parameter init (torch Linear-style uniform) + reference check.
# ----------------------------------------------------------------------------
def init_linear(key, in_f, out_f):
    k1, k2 = jax.random.split(key)
    bound = float(in_f) ** -0.5
    W = jax.random.uniform(k1, (out_f, in_f), jnp.float32, -bound, bound)
    b = jax.random.uniform(k2, (out_f,), jnp.float32, -bound, bound)
    return W, b


def init_params(key, in_channels, hidden, out_channels, num_layers):
    keys = jax.random.split(key, num_layers + 1)
    w_attn, b_attn = init_linear(keys[0], in_channels, 1)
    lins = [init_linear(keys[1], in_channels, hidden)]
    for i in range(num_layers - 2):
        lins.append(init_linear(keys[2 + i], hidden, hidden))
    lins.append(init_linear(keys[num_layers], hidden, out_channels))
    gammas = [jnp.ones((hidden,), jnp.float32) for _ in range(num_layers - 1)]
    betas = [jnp.zeros((hidden,), jnp.float32) for _ in range(num_layers - 1)]
    return {"w_attn": w_attn.reshape(-1), "b_attn": b_attn.reshape(()),
            "lins": lins, "gammas": gammas, "betas": betas}


def reference_forward(x, params, *, relu_last=False, eps=_BN_EPS):
    logits = jnp.einsum("nsd,d->ns", x, params["w_attn"]) + params["b_attn"]
    score = jax.nn.softmax(logits, axis=1)
    h = jnp.einsum("ns,nsd->nd", score, x)
    for i, (W, b) in enumerate(params["lins"][:-1]):
        h = h @ W.T + b

        def bn(v):
            m = v.mean(0, keepdims=True)
            var = ((v - m) ** 2).mean(0, keepdims=True)
            return ((v - m) / jnp.sqrt(var + eps) * params["gammas"][i]
                    + params["betas"][i])

        h = jnp.maximum(bn(h), 0.0) if relu_last else bn(jnp.maximum(h, 0.0))
    W, b = params["lins"][-1]
    return h @ W.T + b


if __name__ == "__main__":
    key = jax.random.PRNGKey(0)
    k_x, k_p = jax.random.split(key)

    N, S, D = 8, 4, 768          # D fixed at 768 by weight_layer = Linear(768, 1)
    hidden, out_channels, num_layers = 32, 16, 3

    x = jax.random.normal(k_x, (N, S, D), jnp.float32)
    params = init_params(k_p, D, hidden, out_channels, num_layers)

    out = mlp_attention_forward(x, params)
    out = jax.block_until_ready(out)

    ref = reference_forward(x, params)
    assert out.shape == (N, out_channels), out.shape
    assert jnp.allclose(out, ref, rtol=2e-4, atol=2e-4), \
        float(jnp.max(jnp.abs(out - ref)))

    print("KERNEL_OK")
</pallas_src>

<mosaic_0001>
module attributes {stable_mosaic.version = 11 : i64} {
  func.func @_attn_linear0_kernel(%arg0: i32, %arg1: memref<8x3072xf32, #tpu.memory_space<vmem>>, %arg2: memref<3072x4xf32, #tpu.memory_space<vmem>>, %arg3: memref<768x32xf32, #tpu.memory_space<vmem>>, %arg4: memref<1x32xf32, #tpu.memory_space<vmem>>, %arg5: memref<1x1xf32, #tpu.memory_space<smem>>, %arg6: memref<8x32xf32, #tpu.memory_space<vmem>>) attributes {dimension_semantics = [#tpu.dimension_semantics<parallel>], iteration_bounds = array<i64: 1>, scalar_prefetch = 0 : i64, scratch_operands = 0 : i64, tpu.core_type = #tpu.core_type<tc>, window_params = [{transform_indices = @transform_0, window_bounds = array<i64: 8, 3072>}, {pipeline_mode = #tpu.pipeline_mode<synchronous>, transform_indices = @transform_1, window_bounds = array<i64: 3072, 4>}, {pipeline_mode = #tpu.pipeline_mode<synchronous>, transform_indices = @transform_2, window_bounds = array<i64: 768, 32>}, {pipeline_mode = #tpu.pipeline_mode<synchronous>, transform_indices = @transform_3, window_bounds = array<i64: 1, 32>}, {transform_indices = @transform_4, window_bounds = array<i64: 1, 1>}, {transform_indices = @transform_5, window_bounds = array<i64: 8, 32>}]} {
    %c0 = arith.constant 0 : index
    %c0_0 = arith.constant 0 : index
    %0 = vector.load %arg1[%c0, %c0_0] : memref<8x3072xf32, #tpu.memory_space<vmem>>, vector<8x3072xf32>
    %c0_1 = arith.constant 0 : index
    %c0_2 = arith.constant 0 : index
    %1 = vector.load %arg2[%c0_1, %c0_2] : memref<3072x4xf32, #tpu.memory_space<vmem>>, vector<3072x4xf32>
    %cst = arith.constant dense<0.000000e+00> : vector<8x4xf32>
    %2 = tpu.matmul %0, %1, %cst {dimension_numbers = #tpu.dot_dimension_numbers<[1], [0], [0], [1], [0, 0, 1, 1], [], []>} : vector<8x3072xf32>, vector<3072x4xf32>, vector<8x4xf32> -> vector<8x4xf32>
    %c0_3 = arith.constant 0 : index
    %c0_4 = arith.constant 0 : index
    %3 = memref.load %arg5[%c0_3, %c0_4] : memref<1x1xf32, #tpu.memory_space<smem>>
    %4 = vector.broadcast %3 : f32 to vector<8x4xf32>
    %5 = arith.addf %2, %4 : vector<8x4xf32>
    %cst_5 = arith.constant dense<0xFF800000> : vector<8xf32>
    %6 = vector.multi_reduction <maximumf>, %5, %cst_5 [1] : vector<8x4xf32> to vector<8xf32>
    %7 = vector.shape_cast %6 : vector<8xf32> to vector<8x1xf32>
    %8 = vector.broadcast %7 : vector<8x1xf32> to vector<8x4xf32>
    %9 = arith.subf %5, %8 : vector<8x4xf32>
    %10 = math.exp %9 : vector<8x4xf32>
    %cst_6 = arith.constant dense<0.000000e+00> : vector<8xf32>
    %11 = vector.multi_reduction <add>, %10, %cst_6 [1] : vector<8x4xf32> to vector<8xf32>
    %12 = vector.shape_cast %11 : vector<8xf32> to vector<8x1xf32>
    %13 = vector.broadcast %12 : vector<8x1xf32> to vector<8x4xf32>
    %14 = arith.divf %10, %13 : vector<8x4xf32>
    %15 = vector.extract_strided_slice %14 {offsets = [0, 0], sizes = [8, 1], strides = [1, 1]} : vector<8x4xf32> to vector<8x1xf32>
    %16 = vector.extract_strided_slice %0 {offsets = [0, 0], sizes = [8, 768], strides = [1, 1]} : vector<8x3072xf32> to vector<8x768xf32>
    %17 = vector.broadcast %15 : vector<8x1xf32> to vector<8x768xf32>
    %18 = arith.mulf %17, %16 : vector<8x768xf32>
    %19 = vector.extract_strided_slice %14 {offsets = [0, 1], sizes = [8, 1], strides = [1, 1]} : vector<8x4xf32> to vector<8x1xf32>
    %20 = vector.extract_strided_slice %0 {offsets = [0, 768], sizes = [8, 768], strides = [1, 1]} : vector<8x3072xf32> to vector<8x768xf32>
    %21 = vector.broadcast %19 : vector<8x1xf32> to vector<8x768xf32>
    %22 = arith.mulf %21, %20 : vector<8x768xf32>
    %23 = arith.addf %18, %22 : vector<8x768xf32>
    %24 = vector.extract_strided_slice %14 {offsets = [0, 2], sizes = [8, 1], strides = [1, 1]} : vector<8x4xf32> to vector<8x1xf32>
    %25 = vector.extract_strided_slice %0 {offsets = [0, 1536], sizes = [8, 768], strides = [1, 1]} : vector<8x3072xf32> to vector<8x768xf32>
    %26 = vector.broadcast %24 : vector<8x1xf32> to vector<8x768xf32>
    %27 = arith.mulf %26, %25 : vector<8x768xf32>
    %28 = arith.addf %23, %27 : vector<8x768xf32>
    %29 = vector.extract_strided_slice %14 {offsets = [0, 3], sizes = [8, 1], strides = [1, 1]} : vector<8x4xf32> to vector<8x1xf32>
    %30 = vector.extract_strided_slice %0 {offsets = [0, 2304], sizes = [8, 768], strides = [1, 1]} : vector<8x3072xf32> to vector<8x768xf32>
    %31 = vector.broadcast %29 : vector<8x1xf32> to vector<8x768xf32>
    %32 = arith.mulf %31, %30 : vector<8x768xf32>
    %33 = arith.addf %28, %32 : vector<8x768xf32>
    %c0_7 = arith.constant 0 : index
    %c0_8 = arith.constant 0 : index
    %34 = vector.load %arg3[%c0_7, %c0_8] : memref<768x32xf32, #tpu.memory_space<vmem>>, vector<768x32xf32>
    %cst_9 = arith.constant dense<0.000000e+00> : vector<8x32xf32>
    %35 = tpu.matmul %33, %34, %cst_9 {dimension_numbers = #tpu.dot_dimension_numbers<[1], [0], [0], [1], [0, 0, 1, 1], [], []>} : vector<8x768xf32>, vector<768x32xf32>, vector<8x32xf32> -> vector<8x32xf32>
    %c0_10 = arith.constant 0 : index
    %c0_11 = arith.constant 0 : index
    %36 = vector.load %arg4[%c0_10, %c0_11] : memref<1x32xf32, #tpu.memory_space<vmem>>, vector<1x32xf32>
    %37 = vector.broadcast %36 : vector<1x32xf32> to vector<8x32xf32>
    %38 = arith.addf %35, %37 : vector<8x32xf32>
    %c0_12 = arith.constant 0 : index
    %c0_13 = arith.constant 0 : index
    %39 = vector.load %arg6[%c0_12, %c0_13] : memref<8x32xf32, #tpu.memory_space<vmem>>, vector<8x32xf32>
    tpu.vector_store %arg6[%c0_12, %c0_13], %38 {strides = array<i32>} : memref<8x32xf32, #tpu.memory_space<vmem>>, vector<8x32xf32>,
    return
  }
  func.func @transform_0(%arg0: i32) -> (i32, i32) {
    %c0_i32 = arith.constant 0 : i32
    %c0_i32_0 = arith.constant 0 : i32
    return %arg0, %c0_i32 : i32, i32
  }
  func.func @transform_1(%arg0: i32) -> (i32, i32) {
    %c0_i32 = arith.constant 0 : i32
    %c0_i32_0 = arith.constant 0 : i32
    %c0_i32_1 = arith.constant 0 : i32
    return %c0_i32, %c0_i32_0 : i32, i32
  }
  func.func @transform_2(%arg0: i32) -> (i32, i32) {
    %c0_i32 = arith.constant 0 : i32
    %c0_i32_0 = arith.constant 0 : i32
    %c0_i32_1 = arith.constant 0 : i32
    return %c0_i32, %c0_i32_0 : i32, i32
  }
  func.func @transform_3(%arg0: i32) -> (i32, i32) {
    %c0_i32 = arith.constant 0 : i32
    %c0_i32_0 = arith.constant 0 : i32
    %c0_i32_1 = arith.constant 0 : i32
    return %c0_i32, %c0_i32_0 : i32, i32
  }
  func.func @transform_4(%arg0: i32) -> (i32, i32) {
    %c0_i32 = arith.constant 0 : i32
    %c0_i32_0 = arith.constant 0 : i32
    %c0_i32_1 = arith.constant 0 : i32
    return %c0_i32, %c0_i32_0 : i32, i32
  }
  func.func @transform_5(%arg0: i32) -> (i32, i32) {
    %c0_i32 = arith.constant 0 : i32
    %c0_i32_0 = arith.constant 0 : i32
    return %arg0, %c0_i32 : i32, i32
  }
}

</mosaic_0001>

<bundles_post_ra>
// kernel: tpu_custom_call.1
= control target key start
LH: loop header
LB: loop body
LE: loop exit
PB: predicated region body
PF: predicated region fallthrough
CT: control target
= control target key end

     0   :  { %s4413_s0 = inlined_call_operand.vmem [shape: f32[8,3072], index: 0, kind: input, shape index: {}]   ;;  %s4414_s1 = inlined_call_operand.vmem [shape: f32[3072,4], index: 1, kind: input, shape index: {}]   ;;  %s4415_s2 = inlined_call_operand.vmem [shape: f32[768,32], index: 2, kind: input, shape index: {}]   ;;  %s4416_s3 = inlined_call_operand.vmem [shape: f32[1,32], index: 3, kind: input, shape index: {}]   ;;  %s4417_s4 = inlined_call_operand.<no memory space> [shape: f32[1,1], index: 4, kind: input, shape index: {}]   ;;  %s4418_s5 = inlined_call_operand.hbm [shape: f32[8,32], index: 5, kind: output, shape index: {}]  }
   0x1   :  { %v62_v0 = vld [vmem:[%s4414_s1 + $0x80] sm:$0xff]  ;;  %v63_v1 = vld [vmem:[%s4414_s1 + $0x88] sm:$0xff]  ;;  %v64_v11 = vld [vmem:[%s4414_s1 + $0x90] sm:$0xff] }
   0x2   :  { %v46_v2 = vld [vmem:[%s4414_s1] sm:$0xff]  ;;  %v2198_v3 = vpack.c.bf16 %v63_v1, %v62_v0  ;;  %v47_v4 = vld [vmem:[%s4414_s1 + $0x8] sm:$0xff]  ;;  %v65_v13 = vld [vmem:[%s4414_s1 + $0x98] sm:$0xff] }
   0x3   :  { %v94_v5 = vld [vmem:[%s4414_s1 + $0x180] sm:$0xff]  ;;  %v95_v6 = vld [vmem:[%s4414_s1 + $0x188] sm:$0xff]  ;;  %v2200_v7 = vpack.c.bf16 %v47_v4, %v46_v2  ;;  %v48_v14 = vld [vmem:[%s4414_s1 + $0x10] sm:$0xff]  ;;  %v2202_v16 = vpack.c.bf16 %v65_v13, %v64_v11 }
   0x4   :  { %v2230_v8 = vpack.c.bf16 %v95_v6, %v94_v5  ;;  %v78_v9 = vld [vmem:[%s4414_s1 + $0x100] sm:$0xff]  ;;  %v79_v10 = vld [vmem:[%s4414_s1 + $0x108] sm:$0xff]  ;;  %2199 = vmatprep.subr.bf16.mxu0 %v2198_v3  ;;  %v49_v15 = vld [vmem:[%s4414_s1 + $0x18] sm:$0xff] }
   0x5   :  { %v2232_v12 = vpack.c.bf16 %v79_v10, %v78_v9  ;;  %2201 = vmatpush3.bf16.msra.mxu0 %v2200_v7  ;;  %v2204_v17 = vpack.c.bf16 %v49_v15, %v48_v14  ;;  %v96_v18 = vld [vmem:[%s4414_s1 + $0x190] sm:$0xff]  ;;  %v97_v19 = vld [vmem:[%s4414_s1 + $0x198] sm:$0xff]  ;;  %v66_v23 = vld [vmem:[%s4414_s1 + $0xa0] sm:$0xff] }
   0x6   :  { %2231 = vmatprep.subr.bf16.mxu1 %v2230_v8  ;;  %v80_v20 = vld [vmem:[%s4414_s1 + $0x110] sm:$0xff]  ;;  %v2234_v21 = vpack.c.bf16 %v97_v19, %v96_v18  ;;  %v81_v22 = vld [vmem:[%s4414_s1 + $0x118] sm:$0xff]  ;;  %v67_v24 = vld [vmem:[%s4414_s1 + $0xa8] sm:$0xff]  ;;  %2203 = vmatprep.subr.bf16.mxu0 %v2202_v16 }
   0x7   :  { %2233 = vmatpush3.bf16.msra.mxu1 %v2232_v12  ;;  %v2236_v25 = vpack.c.bf16 %v81_v22, %v80_v20  ;;  %v2206_v26 = vpack.c.bf16 %v67_v24, %v66_v23  ;;  %v50_v27 = vld [vmem:[%s4414_s1 + $0x20] sm:$0xff]  ;;  %v51_v28 = vld [vmem:[%s4414_s1 + $0x28] sm:$0xff]  ;;  %v68_v35 = vld [vmem:[%s4414_s1 + $0xb0] sm:$0xff] }
   0x8   :  { %v98_v29 = vld [vmem:[%s4414_s1 + $0x1a0] sm:$0xff]  ;;  %2235 = vmatprep.subr.bf16.mxu1 %v2234_v21  ;;  %v99_v30 = vld [vmem:[%s4414_s1 + $0x1a8] sm:$0xff]  ;;  %v2208_v33 = vpack.c.bf16 %v51_v28, %v50_v27  ;;  %v69_v36 = vld [vmem:[%s4414_s1 + $0xb8] sm:$0xff] }
   0x9   :  { %v82_v31 = vld [vmem:[%s4414_s1 + $0x120] sm:$0xff]  ;;  %v83_v32 = vld [vmem:[%s4414_s1 + $0x128] sm:$0xff]  ;;  %2205 = vmatpush3.bf16.msra.mxu0 %v2204_v17  ;;  %v2238_v34 = vpack.c.bf16 %v99_v30, %v98_v29  ;;  %v52_v37 = vld [vmem:[%s4414_s1 + $0x30] sm:$0xff]  ;;  %v2210_v39 = vpack.c.bf16 %v69_v36, %v68_v35 }
   0xa   :  { %2207 = vmatprep.subr.bf16.mxu0 %v2206_v26  ;;  %v2240_v38 = vpack.c.bf16 %v83_v32, %v82_v31  ;;  %v53_v40 = vld [vmem:[%s4414_s1 + $0x38] sm:$0xff]  ;;  %v100_v41 = vld [vmem:[%s4414_s1 + $0x1b0] sm:$0xff]  ;;  %v70_v46 = vld [vmem:[%s4414_s1 + $0xc0] sm:$0xff] }
   0xb   :  { %2237 = vmatpush3.bf16.msra.mxu1 %v2236_v25  ;;  %v101_v42 = vld [vmem:[%s4414_s1 + $0x1b8] sm:$0xff]  ;;  %v84_v44 = vld [vmem:[%s4414_s1 + $0x130] sm:$0xff]  ;;  %v71_v47 = vld [vmem:[%s4414_s1 + $0xc8] sm:$0xff]  ;;  %v2212_v48 = vpack.c.bf16 %v53_v40, %v52_v37 }
   0xc   :  { %2239 = vmatprep.subr.bf16.mxu1 %v2238_v34  ;;  %v2242_v43 = vpack.c.bf16 %v101_v42, %v100_v41  ;;  %v85_v45 = vld [vmem:[%s4414_s1 + $0x138] sm:$0xff]  ;;  %v102_v49 = vld [vmem:[%s4414_s1 + $0x1c0] sm:$0xff]  ;;  %v103_v50 = vld [vmem:[%s4414_s1 + $0x1c8] sm:$0xff]  ;;  %v2214_v52 = vpack.c.bf16 %v71_v47, %v70_v46 }
   0xd   :  { %2209 = vmatpush3.bf16.msra.mxu0 %v2208_v33  ;;  %v2244_v51 = vpack.c.bf16 %v85_v45, %v84_v44  ;;  %v54_v53 = vld [vmem:[%s4414_s1 + $0x40] sm:$0xff]  ;;  %v55_v54 = vld [vmem:[%s4414_s1 + $0x48] sm:$0xff]  ;;  %v2246_v56 = vpack.c.bf16 %v103_v50, %v102_v49  ;;  %v72_v58 = vld [vmem:[%s4414_s1 + $0xd0] sm:$0xff] }
   0xe   :  { %2211 = vmatprep.subr.bf16.mxu0 %v2210_v39  ;;  %v86_v55 = vld [vmem:[%s4414_s1 + $0x140] sm:$0xff]  ;;  %v87_v57 = vld [vmem:[%s4414_s1 + $0x148] sm:$0xff]  ;;  %v73_v59 = vld [vmem:[%s4414_s1 + $0xd8] sm:$0xff]  ;;  %v2216_v62 = vpack.c.bf16 %v55_v54, %v54_v53 }
   0xf   :  { %2241 = vmatpush3.bf16.msra.mxu1 %v2240_v38  ;;  %v104_v60 = vld [vmem:[%s4414_s1 + $0x1d0] sm:$0xff]  ;;  %v105_v61 = vld [vmem:[%s4414_s1 + $0x1d8] sm:$0xff]  ;;  %v2248_v63 = vpack.c.bf16 %v87_v57, %v86_v55  ;;  %v2218_v0 = vpack.c.bf16 %v73_v59, %v72_v58  ;;  %v74_v6 = vld [vmem:[%s4414_s1 + $0xe0] sm:$0xff] }
  0x10   :  { %2243 = vmatprep.subr.bf16.mxu1 %v2242_v43  ;;  %v56_v1 = vld [vmem:[%s4414_s1 + $0x50] sm:$0xff]  ;;  %v57_v2 = vld [vmem:[%s4414_s1 + $0x58] sm:$0xff]  ;;  %v2250_v4 = vpack.c.bf16 %v105_v61, %v104_v60  ;;  %v75_v7 = vld [vmem:[%s4414_s1 + $0xe8] sm:$0xff] }
  0x11   :  { %2213 = vmatpush3.bf16.msra.mxu0 %v2212_v48  ;;  %v88_v3 = vld [vmem:[%s4414_s1 + $0x150] sm:$0xff]  ;;  %v89_v5 = vld [vmem:[%s4414_s1 + $0x158] sm:$0xff]  ;;  %v106_v8 = vld [vmem:[%s4414_s1 + $0x1e0] sm:$0xff]  ;;  %v2220_v10 = vpack.c.bf16 %v57_v2, %v56_v1  ;;  %v2222_v14 = vpack.c.bf16 %v75_v7, %v74_v6 }
  0x12   :  { %2215 = vmatprep.subr.bf16.mxu0 %v2214_v52  ;;  %v107_v9 = vld [vmem:[%s4414_s1 + $0x1e8] sm:$0xff]  ;;  %v58_v11 = vld [vmem:[%s4414_s1 + $0x60] sm:$0xff]  ;;  %v2252_v13 = vpack.c.bf16 %v89_v5, %v88_v3  ;;  %v76_v19 = vld [vmem:[%s4414_s1 + $0xf0] sm:$0xff] }
  0x13   :  { %2245 = vmatpush3.bf16.msra.mxu1 %v2244_v51  ;;  %v59_v12 = vld [vmem:[%s4414_s1 + $0x68] sm:$0xff]  ;;  %v90_v15 = vld [vmem:[%s4414_s1 + $0x160] sm:$0xff]  ;;  %v2254_v18 = vpack.c.bf16 %v107_v9, %v106_v8  ;;  %v77_v20 = vld [vmem:[%s4414_s1 + $0xf8] sm:$0xff] }
  0x14   :  { %2247 = vmatprep.subr.bf16.mxu1 %v2246_v56  ;;  %v91_v16 = vld [vmem:[%s4414_s1 + $0x168] sm:$0xff]  ;;  %v25_v21 = vld [vmem:[%s4413_s0 + $0x18] sm:$0xff]  ;;  %v108_v22 = vld [vmem:[%s4414_s1 + $0x1f0] sm:$0xff]  ;;  %v2224_v24 = vpack.c.bf16 %v59_v12, %v58_v11  ;;  %v2226_v26 = vpack.c.bf16 %v77_v20, %v76_v19 }
  0x15   :  { %2217 = vmatpush3.bf16.msra.mxu0 %v2216_v62  ;;  %v23_v17 = vld [vmem:[%s4413_s0 + $0x8] sm:$0xff]  ;;  %v109_v23 = vld [vmem:[%s4414_s1 + $0x1f8] sm:$0xff]  ;;  %566 = vmatprep.mubr.f32.mxu1 %v25_v21  ;;  %v2256_v25 = vpack.c.bf16 %v91_v16, %v90_v15  ;;  %v60_v27 = vld [vmem:[%s4414_s1 + $0x70] sm:$0xff] }
  0x16   :  { %2219 = vmatprep.subr.bf16.mxu0 %v2218_v0  ;;  %496 = vmatprep.mubr.f32.mxu0 %v23_v17  ;;  %v61_v28 = vld [vmem:[%s4414_s1 + $0x78] sm:$0xff]  ;;  %v92_v29 = vld [vmem:[%s4414_s1 + $0x170] sm:$0xff]  ;;  %v2258_v30 = vpack.c.bf16 %v109_v23, %v108_v22  ;;  %v126_v32 = vld [vmem:[%s4414_s1 + $0x280] sm:$0xff] }
  0x17   :  { %2249 = vmatpush3.bf16.msra.mxu1 %v2248_v63  ;;  %v93_v31 = vld [vmem:[%s4414_s1 + $0x178] sm:$0xff]  ;;  %v127_v33 = vld [vmem:[%s4414_s1 + $0x288] sm:$0xff]  ;;  %v158_v34 = vld [vmem:[%s4414_s1 + $0x380] sm:$0xff]  ;;  %v2228_v36 = vpack.c.bf16 %v61_v28, %v60_v27 }
  0x18   :  { %2251 = vmatprep.subr.bf16.mxu1 %v2250_v4  ;;  %v159_v35 = vld [vmem:[%s4414_s1 + $0x388] sm:$0xff]  ;;  %v2260_v37 = vpack.c.bf16 %v93_v31, %v92_v29  ;;  %v2262_v38 = vpack.c.bf16 %v127_v33, %v126_v32  ;;  %v110_v39 = vld [vmem:[%s4414_s1 + $0x200] sm:$0xff]  ;;  %v128_v44 = vld [vmem:[%s4414_s1 + $0x290] sm:$0xff] }
  0x19   :  { %2221 = vmatpush3.bf16.msra.mxu0 %v2220_v10  ;;  %v111_v40 = vld [vmem:[%s4414_s1 + $0x208] sm:$0xff]  ;;  %v142_v41 = vld [vmem:[%s4414_s1 + $0x300] sm:$0xff]  ;;  %v2294_v42 = vpack.c.bf16 %v159_v35, %v158_v34  ;;  %v129_v45 = vld [vmem:[%s4414_s1 + $0x298] sm:$0xff] }
  0x1a   :  { %2223 = vmatprep.subr.bf16.mxu0 %v2222_v14  ;;  %v143_v43 = vld [vmem:[%s4414_s1 + $0x308] sm:$0xff]  ;;  %v160_v46 = vld [vmem:[%s4414_s1 + $0x390] sm:$0xff]  ;;  %v161_v47 = vld [vmem:[%s4414_s1 + $0x398] sm:$0xff]  ;;  %v2264_v49 = vpack.c.bf16 %v111_v40, %v110_v39  ;;  %v2266_v52 = vpack.c.bf16 %v129_v45, %v128_v44 }
  0x1b   :  { %2253 = vmatpush3.bf16.msra.mxu1 %v2252_v13  ;;  %v22_v48 = vld [vmem:[%s4413_s0] sm:$0xff]  ;;  %v24_v50 = vld [vmem:[%s4413_s0 + $0x10] sm:$0xff]  ;;  %v2296_v51 = vpack.c.bf16 %v143_v43, %v142_v41  ;;  %v113_v54 = vld [vmem:[%s4414_s1 + $0x218] sm:$0xff]  ;;  %v2298_v56 = vpack.c.bf16 %v161_v47, %v160_v46 }
  0x1c   :  { %2255 = vmatprep.subr.bf16.mxu1 %v2254_v18  ;;  %v112_v53 = vld [vmem:[%s4414_s1 + $0x210] sm:$0xff]  ;;  %v145_v57 = vld [vmem:[%s4414_s1 + $0x318] sm:$0xff]  ;;  %v130_v58 = vld [vmem:[%s4414_s1 + $0x2a0] sm:$0xff] }
  0x1d   :  { %2225 = vmatpush3.bf16.msra.mxu0 %v2224_v24  ;;  %v144_v55 = vld [vmem:[%s4414_s1 + $0x310] sm:$0xff]  ;;  %v131_v59 = vld [vmem:[%s4414_s1 + $0x2a8] sm:$0xff]  ;;  %v162_v60 = vld [vmem:[%s4414_s1 + $0x3a0] sm:$0xff]  ;;  %v2268_v62 = vpack.c.bf16 %v113_v54, %v112_v53 }
  0x1e   :  { %2227 = vmatprep.subr.bf16.mxu0 %v2226_v26  ;;  %v163_v61 = vld [vmem:[%s4414_s1 + $0x3a8] sm:$0xff]  ;;  %v2300_v63 = vpack.c.bf16 %v145_v57, %v144_v55  ;;  %v2270_v0 = vpack.c.bf16 %v131_v59, %v130_v58  ;;  %v114_v1 = vld [vmem:[%s4414_s1 + $0x220] sm:$0xff]  ;;  %v132_v6 = vld [vmem:[%s4414_s1 + $0x2b0] sm:$0xff] }
  0x1f   :  { %2257 = vmatpush3.bf16.msra.mxu1 %v2256_v25  ;;  %v115_v2 = vld [vmem:[%s4414_s1 + $0x228] sm:$0xff]  ;;  %v146_v3 = vld [vmem:[%s4414_s1 + $0x320] sm:$0xff]  ;;  %v2302_v4 = vpack.c.bf16 %v163_v61, %v162_v60  ;;  %v133_v7 = vld [vmem:[%s4414_s1 + $0x2b8] sm:$0xff] }
  0x20   :  { %2259 = vmatprep.subr.bf16.mxu1 %v2258_v30  ;;  %v147_v5 = vld [vmem:[%s4414_s1 + $0x328] sm:$0xff]  ;;  %v164_v8 = vld [vmem:[%s4414_s1 + $0x3b0] sm:$0xff]  ;;  %v165_v9 = vld [vmem:[%s4414_s1 + $0x3b8] sm:$0xff]  ;;  %v2272_v10 = vpack.c.bf16 %v115_v2, %v114_v1  ;;  %v2274_v12 = vpack.c.bf16 %v133_v7, %v132_v6 }
  0x21   :  { %2229 = vmatpush3.bf16.msra.mxu0 %v2228_v36  ;;  %v2304_v11 = vpack.c.bf16 %v147_v5, %v146_v3  ;;  %v116_v13 = vld [vmem:[%s4414_s1 + $0x230] sm:$0xff]  ;;  %v117_v14 = vld [vmem:[%s4414_s1 + $0x238] sm:$0xff]  ;;  %v2306_v16 = vpack.c.bf16 %v165_v9, %v164_v8  ;;  %v134_v18 = vld [vmem:[%s4414_s1 + $0x2c0] sm:$0xff] }
  0x22   :  { %2263 = vmatprep.subr.bf16.mxu0 %v2262_v38  ;;  %v148_v15 = vld [vmem:[%s4414_s1 + $0x330] sm:$0xff]  ;;  %v149_v17 = vld [vmem:[%s4414_s1 + $0x338] sm:$0xff]  ;;  %v135_v19 = vld [vmem:[%s4414_s1 + $0x2c8] sm:$0xff]  ;;  %v2276_v22 = vpack.c.bf16 %v117_v14, %v116_v13 }
  0x23   :  { %2261 = vmatpush3.bf16.msra.mxu1 %v2260_v37  ;;  %v166_v20 = vld [vmem:[%s4414_s1 + $0x3c0] sm:$0xff]  ;;  %v167_v21 = vld [vmem:[%s4414_s1 + $0x3c8] sm:$0xff]  ;;  %v2308_v25 = vpack.c.bf16 %v149_v17, %v148_v15  ;;  %v2278_v26 = vpack.c.bf16 %v135_v19, %v134_v18  ;;  %v29_v29 = vld [vmem:[%s4413_s0 + $0x38] sm:$0xff] }
  0x24   :  { %2295 = vmatprep.subr.bf16.mxu1 %v2294_v42  ;;  %497 = vmatmul.mubr.f32.vlgmr.msra.gmra.mrb[0].mxu0 %v22_v48  ;;  %v118_v23 = vld [vmem:[%s4414_s1 + $0x240] sm:$0xff]  ;;  %v27_v24 = vld [vmem:[%s4413_s0 + $0x28] sm:$0xff]  ;;  %v2310_v30 = vpack.c.bf16 %v167_v21, %v166_v20  ;;  %v136_v32 = vld [vmem:[%s4414_s1 + $0x2d0] sm:$0xff] }
  0x25   :  { %2265 = vmatpush3.bf16.msra.mxu0 %v2264_v49  ;;  %v119_v27 = vld [vmem:[%s4414_s1 + $0x248] sm:$0xff]  ;;  %v150_v28 = vld [vmem:[%s4414_s1 + $0x340] sm:$0xff]  ;;  %v137_v33 = vld [vmem:[%s4414_s1 + $0x2d8] sm:$0xff]  ;;  %636 = vmatprep.mubr.f32.mxu0 %v27_v24 }
  0x26   :  { %567 = vmatmul.mubr.f32.vlgmr.msra.gmra.mrb[0].mxu1 %v24_v50  ;;  %2267 = vmatprep.subr.bf16.mxu0 %v2266_v52  ;;  %v151_v31 = vld [vmem:[%s4414_s1 + $0x348] sm:$0xff]  ;;  %v168_v34 = vld [vmem:[%s4414_s1 + $0x3d0] sm:$0xff]  ;;  %v169_v35 = vld [vmem:[%s4414_s1 + $0x3d8] sm:$0xff]  ;;  %v2280_v36 = vpack.c.bf16 %v119_v27, %v118_v23  ;;  %v2282_v38 = vpack.c.bf16 %v137_v33, %v136_v32 }
  0x27   :  { %2297 = vmatpush3.bf16.msra.mxu1 %v2296_v51  ;;  %706 = vmatprep.mubr.f32.mxu1 %v29_v29  ;;  %v2312_v37 = vpack.c.bf16 %v151_v31, %v150_v28  ;;  %v120_v39 = vld [vmem:[%s4414_s1 + $0x250] sm:$0xff]  ;;  %v121_v40 = vld [vmem:[%s4414_s1 + $0x258] sm:$0xff]  ;;  %v2314_v42 = vpack.c.bf16 %v169_v35, %v168_v34  ;;  %v138_v44 = vld [vmem:[%s4414_s1 + $0x2e0] sm:$0xff] }
  0x28   :  { %2299 = vmatprep.subr.bf16.mxu1 %v2298_v56  ;;  %v152_v41 = vld [vmem:[%s4414_s1 + $0x350] sm:$0xff]  ;;  %v153_v43 = vld [vmem:[%s4414_s1 + $0x358] sm:$0xff]  ;;  %v139_v45 = vld [vmem:[%s4414_s1 + $0x2e8] sm:$0xff]  ;;  %v2284_v48 = vpack.c.bf16 %v121_v40, %v120_v39 }
  0x29   :  { %2269 = vmatpush3.bf16.msra.mxu0 %v2268_v62  ;;  %v170_v46 = vld [vmem:[%s4414_s1 + $0x3e0] sm:$0xff]  ;;  %v171_v47 = vld [vmem:[%s4414_s1 + $0x3e8] sm:$0xff]  ;;  %v2316_v49 = vpack.c.bf16 %v153_v43, %v152_v41  ;;  %v2286_v50 = vpack.c.bf16 %v139_v45, %v138_v44  ;;  %v140_v56 = vld [vmem:[%s4414_s1 + $0x2f0] sm:$0xff] }
  0x2a   :  { %2271 = vmatprep.subr.bf16.mxu0 %v2270_v0  ;;  %v122_v51 = vld [vmem:[%s4414_s1 + $0x260] sm:$0xff]  ;;  %v123_v52 = vld [vmem:[%s4414_s1 + $0x268] sm:$0xff]  ;;  %v2318_v54 = vpack.c.bf16 %v171_v47, %v170_v46  ;;  %v141_v57 = vld [vmem:[%s4414_s1 + $0x2f8] sm:$0xff] }
  0x2b   :  { %2301 = vmatpush3.bf16.msra.mxu1 %v2300_v63  ;;  %v154_v53 = vld [vmem:[%s4414_s1 + $0x360] sm:$0xff]  ;;  %v155_v55 = vld [vmem:[%s4414_s1 + $0x368] sm:$0xff]  ;;  %v172_v58 = vld [vmem:[%s4414_s1 + $0x3f0] sm:$0xff]  ;;  %v2288_v60 = vpack.c.bf16 %v123_v52, %v122_v51  ;;  %v2290_v62 = vpack.c.bf16 %v141_v57, %v140_v56 }
  0x2c   :  { %2303 = vmatprep.subr.bf16.mxu1 %v2302_v4  ;;  %v173_v59 = vld [vmem:[%s4414_s1 + $0x3f8] sm:$0xff]  ;;  %v2320_v61 = vpack.c.bf16 %v155_v55, %v154_v53  ;;  %v124_v63 = vld [vmem:[%s4414_s1 + $0x270] sm:$0xff]  ;;  %v190_v4 = vld [vmem:[%s4414_s1 + $0x480] sm:$0xff] }
  0x2d   :  { %2273 = vmatpush3.bf16.msra.mxu0 %v2272_v10  ;;  %v125_v0 = vld [vmem:[%s4414_s1 + $0x278] sm:$0xff]  ;;  %v156_v1 = vld [vmem:[%s4414_s1 + $0x370] sm:$0xff]  ;;  %v2322_v2 = vpack.c.bf16 %v173_v59, %v172_v58  ;;  %v191_v5 = vld [vmem:[%s4414_s1 + $0x488] sm:$0xff] }
  0x2e   :  { %2275 = vmatprep.subr.bf16.mxu0 %v2274_v12  ;;  %v157_v3 = vld [vmem:[%s4414_s1 + $0x378] sm:$0xff]  ;;  %v222_v6 = vld [vmem:[%s4414_s1 + $0x580] sm:$0xff]  ;;  %v223_v7 = vld [vmem:[%s4414_s1 + $0x588] sm:$0xff]  ;;  %v2292_v8 = vpack.c.bf16 %v125_v0, %v124_v63  ;;  %v2326_v10 = vpack.c.bf16 %v191_v5, %v190_v4 }
  0x2f   :  { %2305 = vmatpush3.bf16.msra.mxu1 %v2304_v11  ;;  %v2324_v9 = vpack.c.bf16 %v157_v3, %v156_v1  ;;  %v174_v11 = vld [vmem:[%s4414_s1 + $0x400] sm:$0xff]  ;;  %v175_v12 = vld [vmem:[%s4414_s1 + $0x408] sm:$0xff]  ;;  %v2358_v14 = vpack.c.bf16 %v223_v7, %v222_v6  ;;  %v193_v17 = vld [vmem:[%s4414_s1 + $0x498] sm:$0xff] }
  0x30   :  { %2307 = vmatprep.subr.bf16.mxu1 %v2306_v16  ;;  %v206_v13 = vld [vmem:[%s4414_s1 + $0x500] sm:$0xff]  ;;  %v207_v15 = vld [vmem:[%s4414_s1 + $0x508] sm:$0xff]  ;;  %v192_v16 = vld [vmem:[%s4414_s1 + $0x490] sm:$0xff]  ;;  %v2328_v21 = vpack.c.bf16 %v175_v12, %v174_v11 }
  0x31   :  { %2277 = vmatpush3.bf16.msra.mxu0 %v2276_v22  ;;  %v224_v18 = vld [vmem:[%s4414_s1 + $0x590] sm:$0xff]  ;;  %v225_v19 = vld [vmem:[%s4414_s1 + $0x598] sm:$0xff]  ;;  %v26_v20 = vld [vmem:[%s4413_s0 + $0x20] sm:$0xff]  ;;  %v2360_v23 = vpack.c.bf16 %v207_v15, %v206_v13  ;;  %v2330_v24 = vpack.c.bf16 %v193_v17, %v192_v16 }
  0x32   :  { %2279 = vmatprep.subr.bf16.mxu0 %v2278_v26  ;;  %v28_v22 = vld [vmem:[%s4413_s0 + $0x30] sm:$0xff]  ;;  %v177_v26 = vld [vmem:[%s4414_s1 + $0x418] sm:$0xff]  ;;  %v2362_v28 = vpack.c.bf16 %v225_v19, %v224_v18  ;;  %v195_v31 = vld [vmem:[%s4414_s1 + $0x4a8] sm:$0xff] }
  0x33   :  { %2309 = vmatpush3.bf16.msra.mxu1 %v2308_v25  ;;  %v176_v25 = vld [vmem:[%s4414_s1 + $0x410] sm:$0xff]  ;;  %v209_v29 = vld [vmem:[%s4414_s1 + $0x518] sm:$0xff]  ;;  %v226_v32 = vld [vmem:[%s4414_s1 + $0x5a0] sm:$0xff] }
  0x34   :  { %2311 = vmatprep.subr.bf16.mxu1 %v2310_v30  ;;  %v208_v27 = vld [vmem:[%s4414_s1 + $0x510] sm:$0xff]  ;;  %v194_v30 = vld [vmem:[%s4414_s1 + $0x4a0] sm:$0xff]  ;;  %v227_v33 = vld [vmem:[%s4414_s1 + $0x5a8] sm:$0xff]  ;;  %v2332_v35 = vpack.c.bf16 %v177_v26, %v176_v25 }
  0x35   :  { %2281 = vmatpush3.bf16.msra.mxu0 %v2280_v36  ;;  %v31_v34 = vld [vmem:[%s4413_s0 + $0x48] sm:$0xff]  ;;  %v33_v36 = vld [vmem:[%s4413_s0 + $0x58] sm:$0xff]  ;;  %v178_v39 = vld [vmem:[%s4414_s1 + $0x420] sm:$0xff] }
  0x36   :  { %2283 = vmatprep.subr.bf16.mxu0 %v2282_v38  ;;  %v2334_v38 = vpack.c.bf16 %v195_v31, %v194_v30  ;;  %v179_v40 = vld [vmem:[%s4414_s1 + $0x428] sm:$0xff]  ;;  %v210_v41 = vld [vmem:[%s4414_s1 + $0x520] sm:$0xff]  ;;  %v196_v44 = vld [vmem:[%s4414_s1 + $0x4b0] sm:$0xff] }
  0x37   :  { %2313 = vmatpush3.bf16.msra.mxu1 %v2312_v37  ;;  %v2364_v37 = vpack.c.bf16 %v209_v29, %v208_v27  ;;  %v211_v43 = vld [vmem:[%s4414_s1 + $0x528] sm:$0xff]  ;;  %v197_v45 = vld [vmem:[%s4414_s1 + $0x4b8] sm:$0xff]  ;;  %v228_v46 = vld [vmem:[%s4414_s1 + $0x5b0] sm:$0xff] }
  0x38   :  { %2315 = vmatprep.subr.bf16.mxu1 %v2314_v42  ;;  %v2366_v42 = vpack.c.bf16 %v227_v33, %v226_v32  ;;  %v229_v47 = vld [vmem:[%s4414_s1 + $0x5b8] sm:$0xff]  ;;  %v180_v51 = vld [vmem:[%s4414_s1 + $0x430] sm:$0xff]  ;;  %v198_v56 = vld [vmem:[%s4414_s1 + $0x4c0] sm:$0xff] }
  0x39   :  { %2285 = vmatpush3.bf16.msra.mxu0 %v2284_v48  ;;  %v2336_v48 = vpack.c.bf16 %v179_v40, %v178_v39  ;;  %v181_v52 = vld [vmem:[%s4414_s1 + $0x438] sm:$0xff]  ;;  %v212_v53 = vld [vmem:[%s4414_s1 + $0x530] sm:$0xff]  ;;  %v199_v57 = vld [vmem:[%s4414_s1 + $0x4c8] sm:$0xff] }
  0x3a   :  { %2287 = vmatprep.subr.bf16.mxu0 %v2286_v50  ;;  %v2338_v50 = vpack.c.bf16 %v197_v45, %v196_v44  ;;  %v213_v55 = vld [vmem:[%s4414_s1 + $0x538] sm:$0xff]  ;;  %v230_v58 = vld [vmem:[%s4414_s1 + $0x5c0] sm:$0xff]  ;;  %v231_v59 = vld [vmem:[%s4414_s1 + $0x5c8] sm:$0xff] }
  0x3b   :  { %2317 = vmatpush3.bf16.msra.mxu1 %v2316_v49  ;;  %v2368_v49 = vpack.c.bf16 %v211_v43, %v210_v41  ;;  %v182_v63 = vld [vmem:[%s4414_s1 + $0x440] sm:$0xff]  ;;  %v183_v0 = vld [vmem:[%s4414_s1 + $0x448] sm:$0xff]  ;;  %v200_v4 = vld [vmem:[%s4414_s1 + $0x4d0] sm:$0xff] }
  0x3c   :  { %2319 = vmatprep.subr.bf16.mxu1 %v2318_v54  ;;  %v2370_v54 = vpack.c.bf16 %v229_v47, %v228_v46  ;;  %v214_v1 = vld [vmem:[%s4414_s1 + $0x540] sm:$0xff]  ;;  %v215_v3 = vld [vmem:[%s4414_s1 + $0x548] sm:$0xff]  ;;  %v201_v5 = vld [vmem:[%s4414_s1 + $0x4d8] sm:$0xff] }
  0x3d   :  { %2289 = vmatpush3.bf16.msra.mxu0 %v2288_v60  ;;  %v2340_v60 = vpack.c.bf16 %v181_v52, %v180_v51  ;;  %v232_v6 = vld [vmem:[%s4414_s1 + $0x5d0] sm:$0xff]  ;;  %v233_v7 = vld [vmem:[%s4414_s1 + $0x5d8] sm:$0xff]  ;;  %v202_v16 = vld [vmem:[%s4414_s1 + $0x4e0] sm:$0xff] }
  0x3e   :  { %2291 = vmatprep.subr.bf16.mxu0 %v2290_v62  ;;  %v2342_v62 = vpack.c.bf16 %v199_v57, %v198_v56  ;;  %v184_v11 = vld [vmem:[%s4414_s1 + $0x450] sm:$0xff]  ;;  %v185_v12 = vld [vmem:[%s4414_s1 + $0x458] sm:$0xff]  ;;  %v203_v17 = vld [vmem:[%s4414_s1 + $0x4e8] sm:$0xff] }
  0x3f   :  { %2321 = vmatpush3.bf16.msra.mxu1 %v2320_v61  ;;  %v2372_v61 = vpack.c.bf16 %v213_v55, %v212_v53  ;;  %v216_v13 = vld [vmem:[%s4414_s1 + $0x550] sm:$0xff]  ;;  %v217_v15 = vld [vmem:[%s4414_s1 + $0x558] sm:$0xff]  ;;  %v234_v18 = vld [vmem:[%s4414_s1 + $0x5e0] sm:$0xff] }
  0x40   :  { %2323 = vmatprep.subr.bf16.mxu1 %v2322_v2  ;;  %v2374_v2 = vpack.c.bf16 %v231_v59, %v230_v58  ;;  %v235_v19 = vld [vmem:[%s4414_s1 + $0x5e8] sm:$0xff]  ;;  %v218_v25 = vld [vmem:[%s4414_s1 + $0x560] sm:$0xff]  ;;  %v205_v29 = vld [vmem:[%s4414_s1 + $0x4f8] sm:$0xff] }
  0x41   :  { %2293 = vmatpush3.bf16.msra.mxu0 %v2292_v8  ;;  %v2344_v8 = vpack.c.bf16 %v183_v0, %v182_v63  ;;  %v2382_v26 = vpack.c.bf16 %v235_v19, %v234_v18  ;;  %v219_v27 = vld [vmem:[%s4414_s1 + $0x568] sm:$0xff]  ;;  %v236_v30 = vld [vmem:[%s4414_s1 + $0x5f0] sm:$0xff]  ;;  %v237_v31 = vld [vmem:[%s4414_s1 + $0x5f8] sm:$0xff] }
  0x42   :  { %2327 = vmatprep.subr.bf16.mxu0 %v2326_v10  ;;  %v2346_v10 = vpack.c.bf16 %v201_v5, %v200_v4  ;;  %v2384_v33 = vpack.c.bf16 %v219_v27, %v218_v25  ;;  %v221_v39 = vld [vmem:[%s4414_s1 + $0x578] sm:$0xff]  ;;  %v254_v40 = vld [vmem:[%s4414_s1 + $0x680] sm:$0xff]  ;;  %v255_v41 = vld [vmem:[%s4414_s1 + $0x688] sm:$0xff] }
  0x43   :  { %2325 = vmatpush3.bf16.msra.mxu1 %v2324_v9  ;;  %v2376_v9 = vpack.c.bf16 %v215_v3, %v214_v1  ;;  %v287_v43 = vld [vmem:[%s4414_s1 + $0x788] sm:$0xff]  ;;  %v2390_v46 = vpack.c.bf16 %v255_v41, %v254_v40  ;;  %v238_v47 = vld [vmem:[%s4414_s1 + $0x600] sm:$0xff]  ;;  %v256_v52 = vld [vmem:[%s4414_s1 + $0x690] sm:$0xff] }
  0x44   :  { %2359 = vmatprep.subr.bf16.mxu1 %v2358_v14  ;;  %637 = vmatmul.mubr.f32.vlgmr.msra.gmra.mrb[2].mxu0 %v26_v20  ;;  %v2378_v14 = vpack.c.bf16 %v233_v7, %v232_v6  ;;  %v2348_v20 = vpack.c.bf16 %v185_v12, %v184_v11  ;;  %v271_v51 = vld [vmem:[%s4414_s1 + $0x708] sm:$0xff]  ;;  %v257_v53 = vld [vmem:[%s4414_s1 + $0x698] sm:$0xff]  ;;  %v30_v56 = vld [vmem:[%s4413_s0 + $0x40] sm:$0xff] }
  0x45   :  { %2329 = vmatpush3.bf16.msra.mxu0 %v2328_v21  ;;  %776 = vmatprep.mubr.f32.mxu0 %v31_v34  ;;  %v2380_v21 = vpack.c.bf16 %v217_v15, %v216_v13  ;;  %v289_v55 = vld [vmem:[%s4414_s1 + $0x798] sm:$0xff]  ;;  %v32_v58 = vld [vmem:[%s4413_s0 + $0x50] sm:$0xff]  ;;  %v259_v3 = vld [vmem:[%s4414_s1 + $0x6a8] sm:$0xff] }
  0x46   :  { %707 = vmatmul.mubr.f32.vlgmr.msra.gmra.mrb[2].mxu1 %v28_v22  ;;  %2331 = vmatprep.subr.bf16.mxu0 %v2330_v24  ;;  %v2350_v22 = vpack.c.bf16 %v203_v17, %v202_v16  ;;  %v187_v24 = vld [vmem:[%s4414_s1 + $0x468] sm:$0xff]  ;;  %v272_v63 = vld [vmem:[%s4414_s1 + $0x710] sm:$0xff]  ;;  %v273_v1 = vld [vmem:[%s4414_s1 + $0x718] sm:$0xff] }
  0x47   :  { %2361 = vmatpush3.bf16.msra.mxu1 %v2360_v23  ;;  %846 = vmatprep.mubr.f32.mxu1 %v33_v36  ;;  %v186_v23 = vld [vmem:[%s4414_s1 + $0x460] sm:$0xff]  ;;  %v189_v36 = vld [vmem:[%s4414_s1 + $0x478] sm:$0xff]  ;;  %v291_v5 = vld [vmem:[%s4414_s1 + $0x7a8] sm:$0xff] }
  0x48   :  { %2363 = vmatprep.subr.bf16.mxu1 %v2362_v28  ;;  %v204_v28 = vld [vmem:[%s4414_s1 + $0x4f0] sm:$0xff]  ;;  %v2352_v32 = vpack.c.bf16 %v187_v24, %v186_v23  ;;  %v290_v4 = vld [vmem:[%s4414_s1 + $0x7a0] sm:$0xff]  ;;  %v35_v6 = vld [vmem:[%s4413_s0 + $0x68] sm:$0xff] }
  0x49   :  { %2333 = vmatpush3.bf16.msra.mxu0 %v2332_v35  ;;  %v2354_v34 = vpack.c.bf16 %v205_v29, %v204_v28  ;;  %v188_v35 = vld [vmem:[%s4414_s1 + $0x470] sm:$0xff]  ;;  %v242_v11 = vld [vmem:[%s4414_s1 + $0x620] sm:$0xff]  ;;  %v243_v12 = vld [vmem:[%s4414_s1 + $0x628] sm:$0xff] }
  0x4a   :  { %2335 = vmatprep.subr.bf16.mxu0 %v2334_v38  ;;  %v2386_v38 = vpack.c.bf16 %v237_v31, %v236_v30  ;;  %v2356_v44 = vpack.c.bf16 %v189_v36, %v188_v35  ;;  %v274_v13 = vld [vmem:[%s4414_s1 + $0x720] sm:$0xff]  ;;  %v275_v15 = vld [vmem:[%s4414_s1 + $0x728] sm:$0xff]  ;;  %v260_v16 = vld [vmem:[%s4414_s1 + $0x6b0] sm:$0xff] }
  0x4b   :  { %2365 = vmatpush3.bf16.msra.mxu1 %v2364_v37  ;;  %v220_v37 = vld [vmem:[%s4414_s1 + $0x570] sm:$0xff]  ;;  %v261_v17 = vld [vmem:[%s4414_s1 + $0x6b8] sm:$0xff]  ;;  %v262_v28 = vld [vmem:[%s4414_s1 + $0x6c0] sm:$0xff] }
  0x4c   :  { %2367 = vmatprep.subr.bf16.mxu1 %v2366_v42  ;;  %v286_v42 = vld [vmem:[%s4414_s1 + $0x780] sm:$0xff]  ;;  %v2388_v45 = vpack.c.bf16 %v221_v39, %v220_v37  ;;  %v292_v18 = vld [vmem:[%s4414_s1 + $0x7b0] sm:$0xff]  ;;  %v293_v19 = vld [vmem:[%s4414_s1 + $0x7b8] sm:$0xff] }
  0x4d   :  { %2337 = vmatpush3.bf16.msra.mxu0 %v2336_v48  ;;  %v239_v48 = vld [vmem:[%s4414_s1 + $0x608] sm:$0xff]  ;;  %v244_v23 = vld [vmem:[%s4414_s1 + $0x630] sm:$0xff]  ;;  %v245_v24 = vld [vmem:[%s4414_s1 + $0x638] sm:$0xff] }
  0x4e   :  { %2339 = vmatprep.subr.bf16.mxu0 %v2338_v50  ;;  %v2422_v50 = vpack.c.bf16 %v287_v43, %v286_v42  ;;  %v2392_v57 = vpack.c.bf16 %v239_v48, %v238_v47  ;;  %v276_v25 = vld [vmem:[%s4414_s1 + $0x730] sm:$0xff]  ;;  %v277_v27 = vld [vmem:[%s4414_s1 + $0x738] sm:$0xff]  ;;  %v263_v29 = vld [vmem:[%s4414_s1 + $0x6c8] sm:$0xff] }
  0x4f   :  { %2369 = vmatpush3.bf16.msra.mxu1 %v2368_v49  ;;  %v270_v49 = vld [vmem:[%s4414_s1 + $0x700] sm:$0xff]  ;;  %v295_v31 = vld [vmem:[%s4414_s1 + $0x7c8] sm:$0xff]  ;;  %v264_v40 = vld [vmem:[%s4414_s1 + $0x6d0] sm:$0xff] }
  0x50   :  { %2371 = vmatprep.subr.bf16.mxu1 %v2370_v54  ;;  %v288_v54 = vld [vmem:[%s4414_s1 + $0x790] sm:$0xff]  ;;  %v2424_v59 = vpack.c.bf16 %v271_v51, %v270_v49  ;;  %v294_v30 = vld [vmem:[%s4414_s1 + $0x7c0] sm:$0xff]  ;;  %v247_v36 = vld [vmem:[%s4414_s1 + $0x648] sm:$0xff] }
  0x51   :  { %2341 = vmatpush3.bf16.msra.mxu0 %v2340_v60  ;;  %v2394_v60 = vpack.c.bf16 %v257_v53, %v256_v52  ;;  %v2426_v0 = vpack.c.bf16 %v289_v55, %v288_v54  ;;  %v246_v35 = vld [vmem:[%s4414_s1 + $0x640] sm:$0xff]  ;;  %v279_v39 = vld [vmem:[%s4414_s1 + $0x748] sm:$0xff]  ;;  %v265_v41 = vld [vmem:[%s4414_s1 + $0x6d8] sm:$0xff] }
  0x52   :  { %2343 = vmatprep.subr.bf16.mxu0 %v2342_v62  ;;  %v241_v62 = vld [vmem:[%s4414_s1 + $0x618] sm:$0xff]  ;;  %v278_v37 = vld [vmem:[%s4414_s1 + $0x740] sm:$0xff]  ;;  %v296_v42 = vld [vmem:[%s4414_s1 + $0x7d0] sm:$0xff] }
  0x53   :  { %2373 = vmatpush3.bf16.msra.mxu1 %v2372_v61  ;;  %v240_v61 = vld [vmem:[%s4414_s1 + $0x610] sm:$0xff]  ;;  %v297_v43 = vld [vmem:[%s4414_s1 + $0x7d8] sm:$0xff]  ;;  %v266_v52 = vld [vmem:[%s4414_s1 + $0x6e0] sm:$0xff] }
  0x54   :  { %2375 = vmatprep.subr.bf16.mxu1 %v2374_v2  ;;  %v258_v2 = vld [vmem:[%s4414_s1 + $0x6a0] sm:$0xff]  ;;  %v2396_v7 = vpack.c.bf16 %v241_v62, %v240_v61  ;;  %v248_v47 = vld [vmem:[%s4414_s1 + $0x650] sm:$0xff]  ;;  %v249_v48 = vld [vmem:[%s4414_s1 + $0x658] sm:$0xff] }
  0x55   :  { %2345 = vmatpush3.bf16.msra.mxu0 %v2344_v8  ;;  %v37_v8 = vld [vmem:[%s4413_s0 + $0x78] sm:$0xff]  ;;  %v280_v49 = vld [vmem:[%s4414_s1 + $0x750] sm:$0xff]  ;;  %v267_v53 = vld [vmem:[%s4414_s1 + $0x6e8] sm:$0xff] }
  0x56   :  { %2347 = vmatprep.subr.bf16.mxu0 %v2346_v10  ;;  %v2398_v10 = vpack.c.bf16 %v259_v3, %v258_v2  ;;  %v281_v51 = vld [vmem:[%s4414_s1 + $0x758] sm:$0xff]  ;;  %v298_v54 = vld [vmem:[%s4414_s1 + $0x7e0] sm:$0xff]  ;;  %v299_v55 = vld [vmem:[%s4414_s1 + $0x7e8] sm:$0xff] }
  0x57   :  { %2377 = vmatpush3.bf16.msra.mxu1 %v2376_v9  ;;  %v2428_v9 = vpack.c.bf16 %v273_v1, %v272_v63  ;;  %v282_v61 = vld [vmem:[%s4414_s1 + $0x760] sm:$0xff]  ;;  %v2446_v62 = vpack.c.bf16 %v299_v55, %v298_v54  ;;  %v283_v63 = vld [vmem:[%s4414_s1 + $0x768] sm:$0xff]  ;;  %v269_v1 = vld [vmem:[%s4414_s1 + $0x6f8] sm:$0xff] }
  0x58   :  { %2379 = vmatprep.subr.bf16.mxu1 %v2378_v14  ;;  %v2430_v14 = vpack.c.bf16 %v291_v5, %v290_v4  ;;  %v300_v2 = vld [vmem:[%s4414_s1 + $0x7f0] sm:$0xff]  ;;  %v301_v3 = vld [vmem:[%s4414_s1 + $0x7f8] sm:$0xff]  ;;  %v2448_v5 = vpack.c.bf16 %v283_v63, %v282_v61 }
  0x59   :  { %2349 = vmatpush3.bf16.msra.mxu0 %v2348_v20  ;;  %v2400_v20 = vpack.c.bf16 %v243_v12, %v242_v11  ;;  %v285_v11 = vld [vmem:[%s4414_s1 + $0x778] sm:$0xff]  ;;  %v318_v12 = vld [vmem:[%s4414_s1 + $0x880] sm:$0xff]  ;;  %v356_v54 = vld [vmem:[%s4414_s1 + $0x9b0] sm:$0xff] }
  0x5a   :  { %2351 = vmatprep.subr.bf16.mxu0 %v2350_v22  ;;  %v2402_v22 = vpack.c.bf16 %v261_v17, %v260_v16  ;;  %v357_v55 = vld [vmem:[%s4414_s1 + $0x9b8] sm:$0xff] }
  0x5b   :  { %2381 = vmatpush3.bf16.msra.mxu1 %v2380_v21  ;;  %v2432_v21 = vpack.c.bf16 %v275_v15, %v274_v13  ;;  %v319_v13 = vld [vmem:[%s4414_s1 + $0x888] sm:$0xff] }
  0x5c   :  { %2383 = vmatprep.subr.bf16.mxu1 %v2382_v26  ;;  %v2434_v26 = vpack.c.bf16 %v293_v19, %v292_v18  ;;  %v351_v15 = vld [vmem:[%s4414_s1 + $0x988] sm:$0xff]  ;;  %v2454_v18 = vpack.c.bf16 %v319_v13, %v318_v12  ;;  %v302_v19 = vld [vmem:[%s4414_s1 + $0x800] sm:$0xff] }
  0x5d   :  { %2353 = vmatpush3.bf16.msra.mxu0 %v2352_v32  ;;  %v2404_v32 = vpack.c.bf16 %v245_v24, %v244_v23  ;;  %v335_v23 = vld [vmem:[%s4414_s1 + $0x908] sm:$0xff]  ;;  %v320_v24 = vld [vmem:[%s4414_s1 + $0x890] sm:$0xff] }
  0x5e   :  { %2355 = vmatprep.subr.bf16.mxu0 %v2354_v34  ;;  %v2406_v34 = vpack.c.bf16 %v263_v29, %v262_v28  ;;  %v3614_v28 = vld [vmem:[%s4413_s0 + $0x60] sm:$0xff] }
  0x5f   :  { %2385 = vmatpush3.bf16.msra.mxu1 %v2384_v33  ;;  %v2436_v33 = vpack.c.bf16 %v277_v27, %v276_v25  ;;  %v321_v25 = vld [vmem:[%s4414_s1 + $0x898] sm:$0xff] }
  0x60   :  { %2387 = vmatprep.subr.bf16.mxu1 %v2386_v38  ;;  %v2438_v38 = vpack.c.bf16 %v295_v31, %v294_v30  ;;  %v353_v27 = vld [vmem:[%s4414_s1 + $0x998] sm:$0xff]  ;;  %v3619_v30 = vld [vmem:[%s4413_s0 + $0x70] sm:$0xff] }
  0x61   :  { %2357 = vmatpush3.bf16.msra.mxu0 %v2356_v44  ;;  %v2408_v44 = vpack.c.bf16 %v247_v36, %v246_v35  ;;  %v336_v35 = vld [vmem:[%s4414_s1 + $0x910] sm:$0xff] }
  0x62   :  { %2391 = vmatprep.subr.bf16.mxu0 %v2390_v46  ;;  %v2410_v46 = vpack.c.bf16 %v265_v41, %v264_v40  ;;  %v354_v40 = vld [vmem:[%s4414_s1 + $0x9a0] sm:$0xff]  ;;  %v355_v41 = vld [vmem:[%s4414_s1 + $0x9a8] sm:$0xff] }
  0x63   :  { %2389 = vmatpush3.bf16.msra.mxu1 %v2388_v45  ;;  %v2440_v45 = vpack.c.bf16 %v279_v39, %v278_v37  ;;  %v337_v37 = vld [vmem:[%s4414_s1 + $0x918] sm:$0xff]  ;;  %v323_v39 = vld [vmem:[%s4414_s1 + $0x8a8] sm:$0xff] }
  0x64   :  { %2423 = vmatprep.subr.bf16.mxu1 %v2422_v50  ;;  %777 = vmatmul.mubr.f32.vlgmr.msra.gmra.mrb[4].mxu0 %v30_v56  ;;  %v2442_v50 = vpack.c.bf16 %v297_v43, %v296_v42  ;;  %v2412_v56 = vpack.c.bf16 %v249_v48, %v248_v47  ;;  %v3649_v42 = vld [vmem:[%s4413_s0 + $0x88] sm:$0xff]  ;;  %v306_v47 = vld [vmem:[%s4414_s1 + $0x820] sm:$0xff] }
  0x65   :  { %2393 = vmatpush3.bf16.msra.mxu0 %v2392_v57  ;;  %916 = vmatprep.mubr.f32.mxu0 %v35_v6  ;;  %v2444_v57 = vpack.c.bf16 %v281_v51, %v280_v49  ;;  %v307_v48 = vld [vmem:[%s4414_s1 + $0x828] sm:$0xff]  ;;  %v338_v49 = vld [vmem:[%s4414_s1 + $0x920] sm:$0xff] }
  0x66   :  { %847 = vmatmul.mubr.f32.vlgmr.msra.gmra.mrb[4].mxu1 %v32_v58  ;;  %2395 = vmatprep.subr.bf16.mxu0 %v2394_v60  ;;  %v2414_v58 = vpack.c.bf16 %v267_v53, %v266_v52  ;;  %v251_v60 = vld [vmem:[%s4414_s1 + $0x668] sm:$0xff]  ;;  %v324_v52 = vld [vmem:[%s4414_s1 + $0x8b0] sm:$0xff]  ;;  %v325_v53 = vld [vmem:[%s4414_s1 + $0x8b8] sm:$0xff] }
  0x67   :  { %2425 = vmatpush3.bf16.msra.mxu1 %v2424_v59  ;;  %986 = vmatprep.mubr.f32.mxu1 %v37_v8  ;;  %v250_v59 = vld [vmem:[%s4414_s1 + $0x660] sm:$0xff]  ;;  %v253_v8 = vld [vmem:[%s4414_s1 + $0x678] sm:$0xff]  ;;  %v339_v51 = vld [vmem:[%s4414_s1 + $0x928] sm:$0xff] }
  0x68   :  { %2427 = vmatprep.subr.bf16.mxu1 %v2426_v0  ;;  %v268_v0 = vld [vmem:[%s4414_s1 + $0x6f0] sm:$0xff]  ;;  %v2416_v4 = vpack.c.bf16 %v251_v60, %v250_v59 }
  0x69   :  { %2397 = vmatpush3.bf16.msra.mxu0 %v2396_v7  ;;  %v2418_v6 = vpack.c.bf16 %v269_v1, %v268_v0  ;;  %v252_v7 = vld [vmem:[%s4414_s1 + $0x670] sm:$0xff] }
  0x6a   :  { %2399 = vmatprep.subr.bf16.mxu0 %v2398_v10  ;;  %v2450_v10 = vpack.c.bf16 %v301_v3, %v300_v2  ;;  %v2420_v16 = vpack.c.bf16 %v253_v8, %v252_v7 }
  0x6b   :  { %2429 = vmatpush3.bf16.msra.mxu1 %v2428_v9  ;;  %v284_v9 = vld [vmem:[%s4414_s1 + $0x770] sm:$0xff] }
  0x6c   :  { %2431 = vmatprep.subr.bf16.mxu1 %v2430_v14  ;;  %v350_v14 = vld [vmem:[%s4414_s1 + $0x980] sm:$0xff]  ;;  %v2452_v17 = vpack.c.bf16 %v285_v11, %v284_v9 }
  0x6d   :  { %2401 = vmatpush3.bf16.msra.mxu0 %v2400_v20  ;;  %v303_v20 = vld [vmem:[%s4414_s1 + $0x808] sm:$0xff] }
  0x6e   :  { %2403 = vmatprep.subr.bf16.mxu0 %v2402_v22  ;;  %v2486_v22 = vpack.c.bf16 %v351_v15, %v350_v14  ;;  %v2456_v29 = vpack.c.bf16 %v303_v20, %v302_v19 }
  0x6f   :  { %2433 = vmatpush3.bf16.msra.mxu1 %v2432_v21  ;;  %v334_v21 = vld [vmem:[%s4414_s1 + $0x900] sm:$0xff] }
  0x70   :  { %2435 = vmatprep.subr.bf16.mxu1 %v2434_v26  ;;  %v352_v26 = vld [vmem:[%s4414_s1 + $0x990] sm:$0xff]  ;;  %v2488_v31 = vpack.c.bf16 %v335_v23, %v334_v21 }
  0x71   :  { %2405 = vmatpush3.bf16.msra.mxu0 %v2404_v32  ;;  %v2458_v32 = vpack.c.bf16 %v321_v25, %v320_v24  ;;  %v2490_v36 = vpack.c.bf16 %v353_v27, %v352_v26 }
  0x72   :  { %2407 = vmatprep.subr.bf16.mxu0 %v2406_v34  ;;  %v305_v34 = vld [vmem:[%s4414_s1 + $0x818] sm:$0xff] }
  0x73   :  { %2437 = vmatpush3.bf16.msra.mxu1 %v2436_v33  ;;  %v304_v33 = vld [vmem:[%s4414_s1 + $0x810] sm:$0xff] }
  0x74   :  { %2439 = vmatprep.subr.bf16.mxu1 %v2438_v38  ;;  %v322_v38 = vld [vmem:[%s4414_s1 + $0x8a0] sm:$0xff]  ;;  %v2460_v43 = vpack.c.bf16 %v305_v34, %v304_v33 }
  0x75   :  { %2409 = vmatpush3.bf16.msra.mxu0 %v2408_v44  ;;  %v3655_v44 = vld [vmem:[%s4413_s0 + $0x98] sm:$0xff] }
  0x76   :  { %2411 = vmatprep.subr.bf16.mxu0 %v2410_v46  ;;  %v2462_v46 = vpack.c.bf16 %v323_v39, %v322_v38 }
  0x77   :  { %2441 = vmatpush3.bf16.msra.mxu1 %v2440_v45  ;;  %v2492_v45 = vpack.c.bf16 %v337_v37, %v336_v35 }
  0x78   :  { %2443 = vmatprep.subr.bf16.mxu1 %v2442_v50  ;;  %v2494_v50 = vpack.c.bf16 %v355_v41, %v354_v40 }
  0x79   :  { %2413 = vmatpush3.bf16.msra.mxu0 %v2412_v56  ;;  %v2464_v56 = vpack.c.bf16 %v307_v48, %v306_v47 }
  0x7a   :  { %2415 = vmatprep.subr.bf16.mxu0 %v2414_v58 }
  0x7b   :  { %2445 = vmatpush3.bf16.msra.mxu1 %v2444_v57 }
  0x7c   :  { %2447 = vmatprep.subr.bf16.mxu1 %v2446_v62 }
  0x7d   :  { %2417 = vmatpush3.bf16.msra.mxu0 %v2416_v4 }
  0x7e   :  { %2419 = vmatprep.subr.bf16.mxu0 %v2418_v6 }
  0x7f   :  { %2449 = vmatpush3.bf16.msra.mxu1 %v2448_v5 }
  0x80   :  { %2451 = vmatprep.subr.bf16.mxu1 %v2450_v10 }
  0x81   :  { %2421 = vmatpush3.bf16.msra.mxu0 %v2420_v16 }
  0x82   :  { %2455 = vmatprep.subr.bf16.mxu0 %v2454_v18 }
  0x83   :  { %2453 = vmatpush3.bf16.msra.mxu1 %v2452_v17 }
  0x84   :  { %2487 = vmatprep.subr.bf16.mxu1 %v2486_v22  ;;  %917 = vmatmul.mubr.f32.vlgmr.msra.gmra.mrb[6].mxu0 %v3614_v28 }
  0x85   :  { %2457 = vmatpush3.bf16.msra.mxu0 %v2456_v29  ;;  %1056 = vmatprep.mubr.f32.mxu0 %v3649_v42 }
  0x86   :  { %987 = vmatmul.mubr.f32.vlgmr.msra.gmra.mrb[6].mxu1 %v3619_v30  ;;  %2459 = vmatprep.subr.bf16.mxu0 %v2458_v32 }
  0x87   :  { %2489 = vmatpush3.bf16.msra.mxu1 %v2488_v31  ;;  %1126 = vmatprep.mubr.f32.mxu1 %v3655_v44 }
  0x88   :  { %2491 = vmatprep.subr.bf16.mxu1 %v2490_v36 }
  0x89   :  { %2461 = vmatpush3.bf16.msra.mxu0 %v2460_v43 }
  0x8a   :  { %11 = vsyncpa [#allocation4], 0  ;;  %2463 = vmatprep.subr.bf16.mxu0 %v2462_v46  ;;  %v2496_v57 = vpack.c.bf16 %v339_v51, %v338_v49  ;;  %v2466_v58 = vpack.c.bf16 %v325_v53, %v324_v52  ;;  %v308_v59 = vld [vmem:[%s4414_s1 + $0x830] sm:$0xff]  ;;  %v309_v60 = vld [vmem:[%s4414_s1 + $0x838] sm:$0xff]  ;;  %v2498_v62 = vpack.c.bf16 %v357_v55, %v356_v54  ;;  %vm1272_vm0 = vcmask 31744  }
  0x8b   :  { %2493 = vmatpush3.bf16.msra.mxu1 %v2492_v45  ;;  %v340_v61 = vld [vmem:[%s4414_s1 + $0x930] sm:$0xff]  ;;  %v341_v63 = vld [vmem:[%s4414_s1 + $0x938] sm:$0xff]  ;;  %v326_v0 = vld [vmem:[%s4414_s1 + $0x8c0] sm:$0xff]  ;;  %v2468_v4 = vpack.c.bf16 %v309_v60, %v308_v59  ;;  %vm1656_vm1 = vcmask 261120  }
  0x8c   :  { %2495 = vmatprep.subr.bf16.mxu1 %v2494_v50  ;;  %v327_v1 = vld [vmem:[%s4414_s1 + $0x8c8] sm:$0xff]  ;;  %v358_v2 = vld [vmem:[%s4414_s1 + $0x9c0] sm:$0xff]  ;;  %v2500_v5 = vpack.c.bf16 %v341_v63, %v340_v61  ;;  %v328_v12 = vld [vmem:[%s4414_s1 + $0x8d0] sm:$0xff] }
  0x8d   :  { %v359_v3 = vld [vmem:[%s4414_s1 + $0x9c8] sm:$0xff]  ;;  %2465 = vmatpush3.bf16.msra.mxu0 %v2464_v56  ;;  %v2470_v6 = vpack.c.bf16 %v327_v1, %v326_v0  ;;  %v310_v7 = vld [vmem:[%s4414_s1 + $0x840] sm:$0xff]  ;;  %v329_v13 = vld [vmem:[%s4414_s1 + $0x8d8] sm:$0xff] }
  0x8e   :  { %2467 = vmatprep.subr.bf16.mxu0 %v2466_v58  ;;  %v311_v8 = vld [vmem:[%s4414_s1 + $0x848] sm:$0xff]  ;;  %v342_v9 = vld [vmem:[%s4414_s1 + $0x940] sm:$0xff]  ;;  %v2502_v10 = vpack.c.bf16 %v359_v3, %v358_v2  ;;  %v360_v14 = vld [vmem:[%s4414_s1 + $0x9d0] sm:$0xff]  ;;  %v2474_v18 = vpack.c.bf16 %v329_v13, %v328_v12 }
  0x8f   :  { %2497 = vmatpush3.bf16.msra.mxu1 %v2496_v57  ;;  %v343_v11 = vld [vmem:[%s4414_s1 + $0x948] sm:$0xff]  ;;  %v361_v15 = vld [vmem:[%s4414_s1 + $0x9d8] sm:$0xff]  ;;  %v2472_v16 = vpack.c.bf16 %v311_v8, %v310_v7  ;;  %v312_v19 = vld [vmem:[%s4414_s1 + $0x850] sm:$0xff] }
  0x90   :  { %2499 = vmatprep.subr.bf16.mxu1 %v2498_v62  ;;  %v2504_v17 = vpack.c.bf16 %v343_v11, %v342_v9  ;;  %v313_v20 = vld [vmem:[%s4414_s1 + $0x858] sm:$0xff]  ;;  %v344_v21 = vld [vmem:[%s4414_s1 + $0x950] sm:$0xff]  ;;  %v2506_v22 = vpack.c.bf16 %v361_v15, %v360_v14  ;;  %v330_v24 = vld [vmem:[%s4414_s1 + $0x8e0] sm:$0xff] }
  0x91   :  { %2469 = vmatpush3.bf16.msra.mxu0 %v2468_v4  ;;  %v345_v23 = vld [vmem:[%s4414_s1 + $0x958] sm:$0xff]  ;;  %v331_v25 = vld [vmem:[%s4414_s1 + $0x8e8] sm:$0xff]  ;;  %v362_v26 = vld [vmem:[%s4414_s1 + $0x9e0] sm:$0xff]  ;;  %v2476_v29 = vpack.c.bf16 %v313_v20, %v312_v19 }
  0x92   :  { %2471 = vmatprep.subr.bf16.mxu0 %v2470_v6  ;;  %v363_v27 = vld [vmem:[%s4414_s1 + $0x9e8] sm:$0xff]  ;;  %v2508_v31 = vpack.c.bf16 %v345_v23, %v344_v21  ;;  %v2478_v32 = vpack.c.bf16 %v331_v25, %v330_v24  ;;  %v314_v33 = vld [vmem:[%s4414_s1 + $0x860] sm:$0xff]  ;;  %v332_v38 = vld [vmem:[%s4414_s1 + $0x8f0] sm:$0xff] }
  0x93   :  { %2501 = vmatpush3.bf16.msra.mxu1 %v2500_v5  ;;  %v315_v34 = vld [vmem:[%s4414_s1 + $0x868] sm:$0xff]  ;;  %v346_v35 = vld [vmem:[%s4414_s1 + $0x960] sm:$0xff]  ;;  %v2510_v36 = vpack.c.bf16 %v363_v27, %v362_v26  ;;  %v333_v39 = vld [vmem:[%s4414_s1 + $0x8f8] sm:$0xff] }
  0x94   :  { %2503 = vmatprep.subr.bf16.mxu1 %v2502_v10  ;;  %v347_v37 = vld [vmem:[%s4414_s1 + $0x968] sm:$0xff]  ;;  %v364_v40 = vld [vmem:[%s4414_s1 + $0x9f0] sm:$0xff]  ;;  %v365_v41 = vld [vmem:[%s4414_s1 + $0x9f8] sm:$0xff]  ;;  %v2480_v43 = vpack.c.bf16 %v315_v34, %v314_v33  ;;  %v2482_v46 = vpack.c.bf16 %v333_v39, %v332_v38 }
  0x95   :  { %2473 = vmatpush3.bf16.msra.mxu0 %v2472_v16  ;;  %v2512_v45 = vpack.c.bf16 %v347_v37, %v346_v35  ;;  %v316_v47 = vld [vmem:[%s4414_s1 + $0x870] sm:$0xff]  ;;  %v317_v48 = vld [vmem:[%s4414_s1 + $0x878] sm:$0xff]  ;;  %v2514_v50 = vpack.c.bf16 %v365_v41, %v364_v40  ;;  %v382_v52 = vld [vmem:[%s4414_s1 + $0xa80] sm:$0xff] }
  0x96   :  { %2475 = vmatprep.subr.bf16.mxu0 %v2474_v18  ;;  %v348_v49 = vld [vmem:[%s4414_s1 + $0x970] sm:$0xff]  ;;  %v349_v51 = vld [vmem:[%s4414_s1 + $0x978] sm:$0xff]  ;;  %v383_v53 = vld [vmem:[%s4414_s1 + $0xa88] sm:$0xff]  ;;  %v2484_v56 = vpack.c.bf16 %v317_v48, %v316_v47 }
  0x97   :  { %2505 = vmatpush3.bf16.msra.mxu1 %v2504_v17  ;;  %v414_v54 = vld [vmem:[%s4414_s1 + $0xb80] sm:$0xff]  ;;  %v415_v55 = vld [vmem:[%s4414_s1 + $0xb88] sm:$0xff]  ;;  %v2516_v57 = vpack.c.bf16 %v349_v51, %v348_v49  ;;  %v2518_v58 = vpack.c.bf16 %v383_v53, %v382_v52  ;;  %v384_v0 = vld [vmem:[%s4414_s1 + $0xa90] sm:$0xff] }
  0x98   :  { %2507 = vmatprep.subr.bf16.mxu1 %v2506_v22  ;;  %v366_v59 = vld [vmem:[%s4414_s1 + $0xa00] sm:$0xff]  ;;  %v367_v60 = vld [vmem:[%s4414_s1 + $0xa08] sm:$0xff]  ;;  %v2550_v62 = vpack.c.bf16 %v415_v55, %v414_v54  ;;  %v385_v1 = vld [vmem:[%s4414_s1 + $0xa98] sm:$0xff] }
  0x99   :  { %2477 = vmatpush3.bf16.msra.mxu0 %v2476_v29  ;;  %v398_v61 = vld [vmem:[%s4414_s1 + $0xb00] sm:$0xff]  ;;  %v399_v63 = vld [vmem:[%s4414_s1 + $0xb08] sm:$0xff]  ;;  %v416_v2 = vld [vmem:[%s4414_s1 + $0xb90] sm:$0xff]  ;;  %v2520_v5 = vpack.c.bf16 %v367_v60, %v366_v59  ;;  %v2522_v8 = vpack.c.bf16 %v385_v1, %v384_v0 }
  0x9a   :  { %2479 = vmatprep.subr.bf16.mxu0 %v2478_v32  ;;  %v417_v3 = vld [vmem:[%s4414_s1 + $0xb98] sm:$0xff]  ;;  %v3830_v4 = vld [vmem:[%s4413_s0 + $0x80] sm:$0xff]  ;;  %v3835_v6 = vld [vmem:[%s4413_s0 + $0x90] sm:$0xff]  ;;  %v2552_v7 = vpack.c.bf16 %v399_v63, %v398_v61 }
  0x9b   :  { %2509 = vmatpush3.bf16.msra.mxu1 %v2508_v31  ;;  %v368_v9 = vld [vmem:[%s4414_s1 + $0xa10] sm:$0xff]  ;;  %v369_v10 = vld [vmem:[%s4414_s1 + $0xa18] sm:$0xff]  ;;  %v2554_v12 = vpack.c.bf16 %v417_v3, %v416_v2  ;;  %v386_v14 = vld [vmem:[%s4414_s1 + $0xaa0] sm:$0xff] }
  0x9c   :  { %2511 = vmatprep.subr.bf16.mxu1 %v2510_v36  ;;  %v400_v11 = vld [vmem:[%s4414_s1 + $0xb10] sm:$0xff]  ;;  %v401_v13 = vld [vmem:[%s4414_s1 + $0xb18] sm:$0xff]  ;;  %v387_v15 = vld [vmem:[%s4414_s1 + $0xaa8] sm:$0xff]  ;;  %v2524_v19 = vpack.c.bf16 %v369_v10, %v368_v9 }
  0x9d   :  { %2481 = vmatpush3.bf16.msra.mxu0 %v2480_v43  ;;  %v418_v16 = vld [vmem:[%s4414_s1 + $0xba0] sm:$0xff]  ;;  %v419_v17 = vld [vmem:[%s4414_s1 + $0xba8] sm:$0xff]  ;;  %v3871_v20 = vld [vmem:[%s4413_s0 + $0xb8] sm:$0xff]  ;;  %v2556_v21 = vpack.c.bf16 %v401_v13, %v400_v11  ;;  %v2526_v22 = vpack.c.bf16 %v387_v15, %v386_v14 }
  0x9e   :  { %2483 = vmatprep.subr.bf16.mxu0 %v2482_v46  ;;  %v3865_v18 = vld [vmem:[%s4413_s0 + $0xa8] sm:$0xff]  ;;  %v370_v23 = vld [vmem:[%s4414_s1 + $0xa20] sm:$0xff]  ;;  %v2558_v26 = vpack.c.bf16 %v419_v17, %v418_v16  ;;  %v388_v29 = vld [vmem:[%s4414_s1 + $0xab0] sm:$0xff] }
  0x9f   :  { %2513 = vmatpush3.bf16.msra.mxu1 %v2512_v45  ;;  %v371_v24 = vld [vmem:[%s4414_s1 + $0xa28] sm:$0xff]  ;;  %v402_v25 = vld [vmem:[%s4414_s1 + $0xb20] sm:$0xff]  ;;  %v389_v31 = vld [vmem:[%s4414_s1 + $0xab8] sm:$0xff] }
  0xa0   :  { %2515 = vmatprep.subr.bf16.mxu1 %v2514_v50  ;;  %v403_v27 = vld [vmem:[%s4414_s1 + $0xb28] sm:$0xff]  ;;  %v420_v32 = vld [vmem:[%s4414_s1 + $0xbb0] sm:$0xff]  ;;  %v421_v33 = vld [vmem:[%s4414_s1 + $0xbb8] sm:$0xff]  ;;  %v2528_v34 = vpack.c.bf16 %v371_v24, %v370_v23  ;;  %v2530_v36 = vpack.c.bf16 %v389_v31, %v388_v29 }
  0xa1   :  { %2485 = vmatpush3.bf16.msra.mxu0 %v2484_v56  ;;  %v2560_v35 = vpack.c.bf16 %v403_v27, %v402_v25  ;;  %v372_v37 = vld [vmem:[%s4414_s1 + $0xa30] sm:$0xff]  ;;  %v373_v38 = vld [vmem:[%s4414_s1 + $0xa38] sm:$0xff]  ;;  %v2562_v40 = vpack.c.bf16 %v421_v33, %v420_v32  ;;  %v390_v43 = vld [vmem:[%s4414_s1 + $0xac0] sm:$0xff] }
  0xa2   :  { %2519 = vmatprep.subr.bf16.mxu0 %v2518_v58  ;;  %v404_v39 = vld [vmem:[%s4414_s1 + $0xb30] sm:$0xff]  ;;  %v405_v41 = vld [vmem:[%s4414_s1 + $0xb38] sm:$0xff]  ;;  %v391_v45 = vld [vmem:[%s4414_s1 + $0xac8] sm:$0xff]  ;;  %v2532_v48 = vpack.c.bf16 %v373_v38, %v372_v37 }
  0xa3   :  { %2517 = vmatpush3.bf16.msra.mxu1 %v2516_v57  ;;  %v422_v46 = vld [vmem:[%s4414_s1 + $0xbc0] sm:$0xff]  ;;  %v423_v47 = vld [vmem:[%s4414_s1 + $0xbc8] sm:$0xff]  ;;  %v2564_v49 = vpack.c.bf16 %v405_v41, %v404_v39  ;;  %v2534_v50 = vpack.c.bf16 %v391_v45, %v390_v43  ;;  %v392_v56 = vld [vmem:[%s4414_s1 + $0xad0] sm:$0xff]  ;;  %v431_v39 = vstv %s4417_s4 }
  0xa4   :  { %2551 = vmatprep.subr.bf16.mxu1 %v2550_v62  ;;  %1057 = vmatmul.mubr.f32.vlgmr.msra.gmra.mrb[8].mxu0 %v3830_v4  ;;  %v374_v51 = vld [vmem:[%s4414_s1 + $0xa40] sm:$0xff]  ;;  %v375_v52 = vld [vmem:[%s4414_s1 + $0xa48] sm:$0xff]  ;;  %v2566_v54 = vpack.c.bf16 %v423_v47, %v422_v46  ;;  %v393_v57 = vld [vmem:[%s4414_s1 + $0xad8] sm:$0xff] }
  0xa5   :  { %2521 = vmatpush3.bf16.msra.mxu0 %v2520_v5  ;;  %1196 = vmatprep.mubr.f32.mxu0 %v3865_v18  ;;  %v406_v53 = vld [vmem:[%s4414_s1 + $0xb40] sm:$0xff]  ;;  %v407_v55 = vld [vmem:[%s4414_s1 + $0xb48] sm:$0xff]  ;;  %v424_v58 = vld [vmem:[%s4414_s1 + $0xbd0] sm:$0xff]  ;;  %v2536_v60 = vpack.c.bf16 %v375_v52, %v374_v51  ;;  %v2538_v62 = vpack.c.bf16 %v393_v57, %v392_v56 }
  0xa6   :  { %1127 = vmatmul.mubr.f32.vlgmr.msra.gmra.mrb[8].mxu1 %v3835_v6  ;;  %2523 = vmatprep.subr.bf16.mxu0 %v2522_v8  ;;  %v425_v59 = vld [vmem:[%s4414_s1 + $0xbd8] sm:$0xff]  ;;  %v2568_v61 = vpack.c.bf16 %v407_v55, %v406_v53  ;;  %v376_v63 = vld [vmem:[%s4414_s1 + $0xa50] sm:$0xff]  ;;  %v394_v5 = vld [vmem:[%s4414_s1 + $0xae0] sm:$0xff] }
  0xa7   :  { %2553 = vmatpush3.bf16.msra.mxu1 %v2552_v7  ;;  %1266 = vmatprep.mubr.f32.mxu1 %v3871_v20  ;;  %v377_v0 = vld [vmem:[%s4414_s1 + $0xa58] sm:$0xff]  ;;  %v408_v1 = vld [vmem:[%s4414_s1 + $0xb50] sm:$0xff]  ;;  %v2570_v2 = vpack.c.bf16 %v425_v59, %v424_v58  ;;  %v395_v7 = vld [vmem:[%s4414_s1 + $0xae8] sm:$0xff] }
  0xa8   :  { %2555 = vmatprep.subr.bf16.mxu1 %v2554_v12  ;;  %v409_v3 = vld [vmem:[%s4414_s1 + $0xb58] sm:$0xff]  ;;  %v426_v8 = vld [vmem:[%s4414_s1 + $0xbe0] sm:$0xff]  ;;  %v427_v9 = vld [vmem:[%s4414_s1 + $0xbe8] sm:$0xff]  ;;  %v2540_v10 = vpack.c.bf16 %v377_v0, %v376_v63  ;;  %v2542_v12 = vpack.c.bf16 %v395_v7, %v394_v5 }
  0xa9   :  { %2525 = vmatpush3.bf16.msra.mxu0 %v2524_v19  ;;  %v2572_v11 = vpack.c.bf16 %v409_v3, %v408_v1  ;;  %v378_v13 = vld [vmem:[%s4414_s1 + $0xa60] sm:$0xff]  ;;  %v379_v14 = vld [vmem:[%s4414_s1 + $0xa68] sm:$0xff]  ;;  %v2574_v16 = vpack.c.bf16 %v427_v9, %v426_v8  ;;  %v396_v19 = vld [vmem:[%s4414_s1 + $0xaf0] sm:$0xff] }
  0xaa   :  { %2527 = vmatprep.subr.bf16.mxu0 %v2526_v22  ;;  %v410_v15 = vld [vmem:[%s4414_s1 + $0xb60] sm:$0xff]  ;;  %v411_v17 = vld [vmem:[%s4414_s1 + $0xb68] sm:$0xff]  ;;  %v428_v22 = vld [vmem:[%s4414_s1 + $0xbf0] sm:$0xff]  ;;  %v2544_v24 = vpack.c.bf16 %v379_v14, %v378_v13 }
  0xab   :  { %2557 = vmatpush3.bf16.msra.mxu1 %v2556_v21  ;;  %v397_v21 = vld [vmem:[%s4414_s1 + $0xaf8] sm:$0xff]  ;;  %v2576_v25 = vpack.c.bf16 %v411_v17, %v410_v15  ;;  %v380_v27 = vld [vmem:[%s4414_s1 + $0xa70] sm:$0xff] }
  0xac   :  { %2559 = vmatprep.subr.bf16.mxu1 %v2558_v26  ;;  %v429_v23 = vld [vmem:[%s4414_s1 + $0xbf8] sm:$0xff]  ;;  %v2546_v26 = vpack.c.bf16 %v397_v21, %v396_v19  ;;  %v412_v32 = vld [vmem:[%s4414_s1 + $0xb70] sm:$0xff] }
  0xad   :  { %2529 = vmatpush3.bf16.msra.mxu0 %v2528_v34  ;;  %v381_v29 = vld [vmem:[%s4414_s1 + $0xa78] sm:$0xff]  ;;  %v2578_v31 = vpack.c.bf16 %v429_v23, %v428_v22  ;;  %v4015_v37 = vld [vmem:[%s4413_s0 + $0xb0] sm:$0xff] }
  0xae   :  { %2531 = vmatprep.subr.bf16.mxu0 %v2530_v36  ;;  %v413_v33 = vld [vmem:[%s4414_s1 + $0xb78] sm:$0xff]  ;;  %v2548_v34 = vpack.c.bf16 %v381_v29, %v380_v27  ;;  %v4010_v36 = vld [vmem:[%s4413_s0 + $0xa0] sm:$0xff] }
  0xaf   :  { %2561 = vmatpush3.bf16.msra.mxu1 %v2560_v35  ;;  %v2580_v35 = vpack.c.bf16 %v413_v33, %v412_v32 }
  0xb0   :  { %2563 = vmatprep.subr.bf16.mxu1 %v2562_v40 }
  0xb1   :  { %2533 = vmatpush3.bf16.msra.mxu0 %v2532_v48 }
  0xb2   :  { %2535 = vmatprep.subr.bf16.mxu0 %v2534_v50 }
  0xb3   :  { %2565 = vmatpush3.bf16.msra.mxu1 %v2564_v49 }
  0xb4   :  { %2567 = vmatprep.subr.bf16.mxu1 %v2566_v54 }
  0xb5   :  { %2537 = vmatpush3.bf16.msra.mxu0 %v2536_v60 }
  0xb6   :  { %2539 = vmatprep.subr.bf16.mxu0 %v2538_v62 }
  0xb7   :  { %2569 = vmatpush3.bf16.msra.mxu1 %v2568_v61 }
  0xb8   :  { %2571 = vmatprep.subr.bf16.mxu1 %v2570_v2 }
  0xb9   :  { %2541 = vmatpush3.bf16.msra.mxu0 %v2540_v10 }
  0xba   :  { %2543 = vmatprep.subr.bf16.mxu0 %v2542_v12 }
  0xbb   :  { %2573 = vmatpush3.bf16.msra.mxu1 %v2572_v11 }
  0xbc   :  { %2575 = vmatprep.subr.bf16.mxu1 %v2574_v16 }
  0xbd   :  { %2545 = vmatpush3.bf16.msra.mxu0 %v2544_v24 }
  0xbe   :  { %2547 = vmatprep.subr.bf16.mxu0 %v2546_v26 }
  0xbf   :  { %2577 = vmatpush3.bf16.msra.mxu1 %v2576_v25 }
  0xc0   :  { %2579 = vmatprep.subr.bf16.mxu1 %v2578_v31 }
  0xc1   :  { %2549 = vmatpush3.bf16.msra.mxu0 %v2548_v34 }
  0xc3   :  { %2581 = vmatpush3.bf16.msra.mxu1 %v2580_v35 }
  0xc4   :  { %1197 = vmatmul.mubr.f32.vlgmr.msra.gmra.mrb[10].mxu0 %v4010_v36 }
  0xc6   :  { %1267 = vmatmul.mubr.f32.vlgmr.msra.gmra.mrb[10].mxu1 %v4015_v37 }
  0xf7   :  { %v1705_v38 = vpop.f32.mrb[0].mxu0 }
  0xf8   :  { %v1706_v40 = vpop.f32.mrb[1].mxu0 }
  0xf9   :  { %v1740_v41 = vpop.f32.mrb[0].mxu1  ;;  %v1707_v43 = vadd.f32 %v1706_v40, %v1705_v38  ;;  %v2731_v40 = vmov 0  }
  0xfa   :  { %v1741_v45 = vpop.f32.mrb[1].mxu1  ;;  %2683 = vset.pattern.permute.xlu1 %v2731_v40 }
  0xfb   :  { %v1742_v46 = vadd.f32 %v1741_v45, %v1740_v41  ;;  %v499_v47 = vadd.f32 %v1707_v43, %v431_v39  ;;  %v2730_v39 = vmov 2   ;;  %v1359_v41 = vld [vmem:[%s4415_s2 + $0x80] sm:$0xff]  ;;  %v1360_v43 = vld [vmem:[%s4415_s2 + $0x88] sm:$0xff] }
  0xfc   :  { %2685 = vset.pattern.permute.xlu0 %v2730_v39  ;;  %v1343_v45 = vld [vmem:[%s4415_s2] sm:$0xff] }
  0xfd   :  { %v569_v48 = vadd.f32 %v1742_v46, %v499_v47  ;;  %v2582_v46 = vpack.c.bf16 %v1360_v43, %v1359_v41  ;;  %v1344_v47 = vld [vmem:[%s4415_s2 + $0x8] sm:$0xff]  ;;  %v1351_v41 = vld [vmem:[%s4415_s2 + $0x40] sm:$0xff] }
  0xfe   :  { %v1352_v43 = vld [vmem:[%s4415_s2 + $0x48] sm:$0xff] }
  0xff   :  { %2583 = vmatprep.subr.bf16.mxu0 %v2582_v46  ;;  %v2600_v46 = vpack.c.bf16 %v1352_v43, %v1351_v41  ;;  %v2692_v43 = vld [vmem:[%s4413_s0] sm:$0xff] }
 0x117   :  { %v1775_v49 = vpop.f32.mrb[2].mxu0 }
 0x118   :  { %v1776_v50 = vpop.f32.mrb[3].mxu0 }
 0x119   :  { %v1810_v51 = vpop.f32.mrb[2].mxu1  ;;  %v1777_v52 = vadd.f32 %v1776_v50, %v1775_v49  ;;  %v1392_v49 = vld [vmem:[%s4415_s2 + $0x188] sm:$0xff]  ;;  %v2584_v50 = vpack.c.bf16 %v1344_v47, %v1343_v45 }
 0x11a   :  { %v1811_v53 = vpop.f32.mrb[3].mxu1 }
 0x11b   :  { %v1812_v54 = vadd.f32 %v1811_v53, %v1810_v51  ;;  %v639_v55 = vadd.f32 %v1777_v52, %v569_v48  ;;  %v1391_v48 = vld [vmem:[%s4415_s2 + $0x180] sm:$0xff]  ;;  %v1376_v53 = vld [vmem:[%s4415_s2 + $0x108] sm:$0xff]  ;;  %2585 = vmatpush3.bf16.msra.mxu0 %v2584_v50 }
 0x11c   :  { %v2614_v51 = vpack.c.bf16 %v1392_v49, %v1391_v48  ;;  %v1375_v52 = vld [vmem:[%s4415_s2 + $0x100] sm:$0xff] }
 0x11d   :  { %v709_v56 = vadd.f32 %v1812_v54, %v639_v55  ;;  %v1361_v54 = vld [vmem:[%s4415_s2 + $0x90] sm:$0xff]  ;;  %v2616_v55 = vpack.c.bf16 %v1376_v53, %v1375_v52  ;;  %v1383_v50 = vld [vmem:[%s4415_s2 + $0x140] sm:$0xff] }
 0x11e   :  { %2615 = vmatprep.subr.bf16.mxu1 %v2614_v51  ;;  %v1384_v51 = vld [vmem:[%s4415_s2 + $0x148] sm:$0xff]  ;;  %v1369_v53 = vld [vmem:[%s4415_s2 + $0xd0] sm:$0xff] }
 0x11f   :  { %2617 = vmatpush3.bf16.msra.mxu1 %v2616_v55  ;;  %v2632_v52 = vpack.c.bf16 %v1384_v51, %v1383_v50  ;;  %v1353_v55 = vld [vmem:[%s4415_s2 + $0x50] sm:$0xff]  ;;  %v2696_v51 = vld [vmem:[%s4413_s0 + $0x8] sm:$0xff] }
 0x137   :  { %v1845_v57 = vpop.f32.mrb[4].mxu0 }
 0x138   :  { %v1846_v58 = vpop.f32.mrb[5].mxu0 }
 0x139   :  { %v1880_v59 = vpop.f32.mrb[4].mxu1  ;;  %v1847_v60 = vadd.f32 %v1846_v58, %v1845_v57  ;;  %v1345_v57 = vld [vmem:[%s4415_s2 + $0x10] sm:$0xff]  ;;  %v1346_v58 = vld [vmem:[%s4415_s2 + $0x18] sm:$0xff] }
 0x13a   :  { %v1881_v61 = vpop.f32.mrb[5].mxu1 }
 0x13b   :  { %v1882_v62 = vadd.f32 %v1881_v61, %v1880_v59  ;;  %v779_v63 = vadd.f32 %v1847_v60, %v709_v56  ;;  %v1362_v56 = vld [vmem:[%s4415_s2 + $0x98] sm:$0xff]  ;;  %v2588_v60 = vpack.c.bf16 %v1346_v58, %v1345_v57  ;;  %v1393_v61 = vld [vmem:[%s4415_s2 + $0x190] sm:$0xff] }
 0x13c   :  { %v2586_v59 = vpack.c.bf16 %v1362_v56, %v1361_v54  ;;  %v1370_v54 = vld [vmem:[%s4415_s2 + $0xd8] sm:$0xff]  ;;  %v1401_v57 = vld [vmem:[%s4415_s2 + $0x1d0] sm:$0xff] }
 0x13d   :  { %v849_v0 = vadd.f32 %v1882_v62, %v779_v63  ;;  %v1394_v62 = vld [vmem:[%s4415_s2 + $0x198] sm:$0xff]  ;;  %v1377_v63 = vld [vmem:[%s4415_s2 + $0x110] sm:$0xff] }
 0x13e   :  { %2587 = vmatprep.subr.bf16.mxu0 %v2586_v59  ;;  %v1354_v56 = vld [vmem:[%s4415_s2 + $0x58] sm:$0xff] }
 0x13f   :  { %2589 = vmatpush3.bf16.msra.mxu0 %v2588_v60  ;;  %v2604_v58 = vpack.c.bf16 %v1354_v56, %v1353_v55  ;;  %v1402_v59 = vld [vmem:[%s4415_s2 + $0x1d8] sm:$0xff]  ;;  %v1385_v60 = vld [vmem:[%s4415_s2 + $0x150] sm:$0xff]  ;;  %v2699_v56 = vld [vmem:[%s4413_s0 + $0x48] sm:$0xff] }
 0x157   :  { %v1915_v1 = vpop.f32.mrb[6].mxu0 }
 0x158   :  { %v1916_v2 = vpop.f32.mrb[7].mxu0 }
 0x159   :  { %v1950_v3 = vpop.f32.mrb[6].mxu1  ;;  %v1917_v5 = vadd.f32 %v1916_v2, %v1915_v1  ;;  %v1378_v1 = vld [vmem:[%s4415_s2 + $0x118] sm:$0xff]  ;;  %v1363_v2 = vld [vmem:[%s4415_s2 + $0xa0] sm:$0xff] }
 0x15a   :  { %v1951_v7 = vpop.f32.mrb[7].mxu1 }
 0x15b   :  { %v1952_v8 = vadd.f32 %v1951_v7, %v1950_v3  ;;  %v919_v9 = vadd.f32 %v1917_v5, %v849_v0  ;;  %v2618_v0 = vpack.c.bf16 %v1394_v62, %v1393_v61  ;;  %v1364_v3 = vld [vmem:[%s4415_s2 + $0xa8] sm:$0xff]  ;;  %v2620_v5 = vpack.c.bf16 %v1378_v1, %v1377_v63  ;;  %v1386_v61 = vld [vmem:[%s4415_s2 + $0x158] sm:$0xff]  ;;  %v1371_v1 = vld [vmem:[%s4415_s2 + $0xe0] sm:$0xff] }
 0x15c   :  { %v2590_v7 = vpack.c.bf16 %v1364_v3, %v1363_v2  ;;  %v2634_v62 = vpack.c.bf16 %v1402_v59, %v1401_v57  ;;  %v2636_v63 = vpack.c.bf16 %v1386_v61, %v1385_v60  ;;  %v1372_v2 = vld [vmem:[%s4415_s2 + $0xe8] sm:$0xff]  ;;  %v2701_v60 = vld [vmem:[%s4413_s0 + $0x58] sm:$0xff] }
 0x15d   :  { %v989_v10 = vadd.f32 %v1952_v8, %v919_v9  ;;  %v1347_v8 = vld [vmem:[%s4415_s2 + $0x20] sm:$0xff]  ;;  %v1348_v9 = vld [vmem:[%s4415_s2 + $0x28] sm:$0xff]  ;;  %2619 = vmatprep.subr.bf16.mxu1 %v2618_v0  ;;  %v2732_v0 = vmov 1   ;;  %v2606_v3 = vpack.c.bf16 %v1372_v2, %v1371_v1 }
 0x15e   :  { %2621 = vmatpush3.bf16.msra.mxu1 %v2620_v5  ;;  %2591 = vmatprep.subr.bf16.mxu0 %v2590_v7  ;;  %v1355_v5 = vld [vmem:[%s4415_s2 + $0x60] sm:$0xff]  ;;  %v1356_v7 = vld [vmem:[%s4415_s2 + $0x68] sm:$0xff] }
 0x177   :  { %v1985_v11 = vpop.f32.mrb[8].mxu0 }
 0x178   :  { %v1986_v12 = vpop.f32.mrb[9].mxu0 }
 0x179   :  { %v2020_v13 = vpop.f32.mrb[8].mxu1  ;;  %v1987_v14 = vadd.f32 %v1986_v12, %v1985_v11  ;;  %v1396_v11 = vld [vmem:[%s4415_s2 + $0x1a8] sm:$0xff]  ;;  %v1379_v12 = vld [vmem:[%s4415_s2 + $0x120] sm:$0xff] }
 0x17a   :  { %v2021_v15 = vpop.f32.mrb[9].mxu1 }
 0x17b   :  { %v2022_v16 = vadd.f32 %v2021_v15, %v2020_v13  ;;  %v1059_v17 = vadd.f32 %v1987_v14, %v989_v10  ;;  %v1395_v10 = vld [vmem:[%s4415_s2 + $0x1a0] sm:$0xff]  ;;  %v1380_v13 = vld [vmem:[%s4415_s2 + $0x128] sm:$0xff]  ;;  %v2592_v14 = vpack.c.bf16 %v1348_v9, %v1347_v8  ;;  %v2608_v9 = vpack.c.bf16 %v1356_v7, %v1355_v5  ;;  %v2703_v5 = vld [vmem:[%s4413_s0 + $0x78] sm:$0xff] }
 0x17c   :  { %v2622_v15 = vpack.c.bf16 %v1396_v11, %v1395_v10  ;;  %v1403_v8 = vld [vmem:[%s4415_s2 + $0x1e0] sm:$0xff]  ;;  %v1404_v10 = vld [vmem:[%s4415_s2 + $0x1e8] sm:$0xff] }
 0x17d   :  { %v1129_v19 = vadd.f32 %v2022_v16, %v1059_v17  ;;  %v1365_v16 = vld [vmem:[%s4415_s2 + $0xb0] sm:$0xff]  ;;  %v1366_v17 = vld [vmem:[%s4415_s2 + $0xb8] sm:$0xff]  ;;  %2593 = vmatpush3.bf16.msra.mxu0 %v2592_v14  ;;  %v1387_v11 = vld [vmem:[%s4415_s2 + $0x160] sm:$0xff]  ;;  %v2638_v14 = vpack.c.bf16 %v1404_v10, %v1403_v8 }
 0x17e   :  { %2623 = vmatprep.subr.bf16.mxu1 %v2622_v15 }
 0x197   :  { %v2055_v21 = vpop.f32.mrb[10].mxu0 }
 0x198   :  { %v2056_v22 = vpop.f32.mrb[11].mxu0 }
 0x199   :  { %v2090_v23 = vpop.f32.mrb[10].mxu1  ;;  %v2057_v24 = vadd.f32 %v2056_v22, %v2055_v21  ;;  %v2624_v21 = vpack.c.bf16 %v1380_v13, %v1379_v12  ;;  %v2594_v22 = vpack.c.bf16 %v1366_v17, %v1365_v16  ;;  %v1388_v12 = vld [vmem:[%s4415_s2 + $0x168] sm:$0xff]  ;;  %v2733_v13 = vmov 3   ;;  %v1373_v16 = vld [vmem:[%s4415_s2 + $0xf0] sm:$0xff]  ;;  %v1374_v17 = vld [vmem:[%s4415_s2 + $0xf8] sm:$0xff] }
 0x19a   :  { %v2091_v25 = vpop.f32.mrb[11].mxu1  ;;  %v2640_v15 = vpack.c.bf16 %v1388_v12, %v1387_v11 }
 0x19b   :  { %v2092_v26 = vadd.f32 %v2091_v25, %v2090_v23  ;;  %v1199_v27 = vadd.f32 %v2057_v24, %v1129_v19  ;;  %v1349_v19 = vld [vmem:[%s4415_s2 + $0x30] sm:$0xff]  ;;  %v1350_v23 = vld [vmem:[%s4415_s2 + $0x38] sm:$0xff]  ;;  %2625 = vmatpush3.bf16.msra.mxu1 %v2624_v21  ;;  %2595 = vmatprep.subr.bf16.mxu0 %v2594_v22 }
 0x19c   :  { %v1397_v24 = vld [vmem:[%s4415_s2 + $0x1b0] sm:$0xff]  ;;  %v1398_v25 = vld [vmem:[%s4415_s2 + $0x1b8] sm:$0xff] }
 0x19d   :  { %v1269_v29 = vadd.f32 %v2092_v26, %v1199_v27  ;;  %v2626_v26 = vpack.c.bf16 %v1398_v25, %v1397_v24  ;;  %v1381_v27 = vld [vmem:[%s4415_s2 + $0x130] sm:$0xff]  ;;  %v1358_v22 = vld [vmem:[%s4415_s2 + $0x78] sm:$0xff] }
 0x19e   :  { %v1357_v21 = vld [vmem:[%s4415_s2 + $0x70] sm:$0xff]  ;;  %v1406_v25 = vld [vmem:[%s4415_s2 + $0x1f8] sm:$0xff] }
 0x19f   :  { %v1273_v31 = vsel %vm1272_vm0, %v1269_v29, -inf  ;;  %2627 = vmatprep.subr.bf16.mxu1 %v2626_v26  ;;  %v2612_v24 = vpack.c.bf16 %v1358_v22, %v1357_v21  ;;  %v1389_v26 = vld [vmem:[%s4415_s2 + $0x170] sm:$0xff]  ;;  %v1426_v22 = vld [vmem:[%s4415_s2 + $0x298] sm:$0xff] }
 0x1a0   :  { %1274 = vmax.xlane.f32.xlu0 %v1273_v31  ;;  %v1367_v31 = vld [vmem:[%s4415_s2 + $0xc0] sm:$0xff]  ;;  %v1425_v21 = vld [vmem:[%s4415_s2 + $0x290] sm:$0xff] }
 0x22d   :  { %v1275_v32 = vpop.xlane.xlu0 %1274 }
 0x22e   :  { %v1276_v33 = vsub.f32 %v1269_v29, %v1275_v32  ;;  %v1382_v29 = vld [vmem:[%s4415_s2 + $0x138] sm:$0xff]  ;;  %v1368_v32 = vld [vmem:[%s4415_s2 + $0xc8] sm:$0xff] }
 0x22f   :  { %v2628_v39 = vpack.c.bf16 %v1382_v29, %v1381_v27  ;;  %v2598_v40 = vpack.c.bf16 %v1368_v32, %v1367_v31  ;;  %v1390_v27 = vld [vmem:[%s4415_s2 + $0x178] sm:$0xff]  ;;  %v1423_v32 = vld [vmem:[%s4415_s2 + $0x280] sm:$0xff] }
 0x230   :  { %v1277_v34 = vmul.f32 1.442695, %v1276_v33  ;;  %v2596_v33 = vpack.c.bf16 %v1350_v23, %v1349_v19  ;;  %v2610_v19 = vpack.c.bf16 %v1374_v17, %v1373_v16  ;;  %v1405_v23 = vld [vmem:[%s4415_s2 + $0x1f0] sm:$0xff]  ;;  %v2644_v31 = vpack.c.bf16 %v1390_v27, %v1389_v26 }
 0x231   :  { %2629 = vmatpush3.bf16.msra.mxu1 %v2628_v39  ;;  %v2642_v29 = vpack.c.bf16 %v1406_v25, %v1405_v23 }
 0x232   :  { %2688 = vpow2.f32 %v1277_v34  ;;  %v1399_v34 = vld [vmem:[%s4415_s2 + $0x1c0] sm:$0xff]  ;;  %2597 = vmatpush3.bf16.msra.mxu0 %v2596_v33  ;;  %v1424_v33 = vld [vmem:[%s4415_s2 + $0x288] sm:$0xff] }
 0x233   :  { %2599 = vmatprep.subr.bf16.mxu0 %v2598_v40 }
 0x236   :  { %2601 = vmatpush3.bf16.msra.mxu0 %v2600_v46  ;;  %v2693_v46 = vld [vmem:[%s4413_s0 + $0x10] sm:$0xff] }
 0x23c   :  { %v4022_v35 = vpop.eup %2688 }
 0x23d   :  { %v1279_v38 = vsel %vm1272_vm0, %v4022_v35, 0.0 }
 0x23e   :  { %1280 = vadd.xlane.f32.xlu0 %v1279_v38  ;;  %v1400_v38 = vld [vmem:[%s4415_s2 + $0x1c8] sm:$0xff] }
 0x23f   :  { %v2630_v45 = vpack.c.bf16 %v1400_v38, %v1399_v34  ;;  %v2646_v34 = vpack.c.bf16 %v1424_v33, %v1423_v32  ;;  %v1410_v32 = vld [vmem:[%s4415_s2 + $0x218] sm:$0xff] }
 0x241   :  { %2631 = vmatprep.subr.bf16.mxu1 %v2630_v45 }
 0x242   :  { %2633 = vmatpush3.bf16.msra.mxu1 %v2632_v52 }
 0x243   :  { %2635 = vmatprep.subr.bf16.mxu1 %v2634_v62 }
 0x246   :  { %2637 = vmatpush3.bf16.msra.mxu1 %v2636_v63  ;;  %v2702_v63 = vld [vmem:[%s4413_s0 + $0x68] sm:$0xff] }
 0x247   :  { %2639 = vmatprep.subr.bf16.mxu1 %v2638_v14  ;;  %v1408_v14 = vld [vmem:[%s4415_s2 + $0x208] sm:$0xff] }
 0x24a   :  { %2641 = vmatpush3.bf16.msra.mxu1 %v2640_v15 }
 0x24b   :  { %2643 = vmatprep.subr.bf16.mxu1 %v2642_v29  ;;  %v2650_v29 = vpack.c.bf16 %v1426_v22, %v1425_v21 }
 0x24e   :  { %2645 = vmatpush3.bf16.msra.mxu1 %v2644_v31  ;;  %v1409_v31 = vld [vmem:[%s4415_s2 + $0x210] sm:$0xff] }
 0x2cb   :  { %v1281_v47 = vpop.xlane.xlu0 %1280 }
 0x2cc   :  { %2690 = vrcp.f32 %v1281_v47 }
 0x2d6   :  { %v2691_v48 = vpop.eup %2690 }
 0x2d7   :  { %v1283_v49 = vmul.f32 %v2691_v48, %v4022_v35  ;;  %v2602_v35 = vpack.c.bf16 %v1370_v54, %v1369_v53  ;;  %v2697_v53 = vld [vmem:[%s4413_s0 + $0x38] sm:$0xff] }
 0x2d9   :  { %1312 = vperm.xlu0 %2685, %v1283_v49   ;;  %1286 = vperm.xlu1 %2683, %v1283_v49  }
 0x2da   :  { %2603 = vmatprep.subr.bf16.mxu0 %v2602_v35  ;;  %v2698_v35 = vld [vmem:[%s4413_s0 + $0x18] sm:$0xff] }
 0x2db   :  { %2605 = vmatpush3.bf16.msra.mxu0 %v2604_v58  ;;  %v2700_v58 = vld [vmem:[%s4413_s0 + $0x28] sm:$0xff] }
 0x2dc   :  { %2607 = vmatprep.subr.bf16.mxu0 %v2606_v3 }
 0x2dd   :  { %2684 = vset.pattern.permute.xlu1 %v2732_v0  ;;  %2687 = vset.pattern.permute.xlu0 %v2733_v13 }
 0x2de   :  { %1296 = vperm.xlu1 %2684, %v1283_v49  }
 0x2df   :  { %2609 = vmatpush3.bf16.msra.mxu0 %v2608_v9 }
 0x2e0   :  { %2611 = vmatprep.subr.bf16.mxu0 %v2610_v19 }
 0x2e2   :  { %2686 = vset.pattern.permute.xlu1 %v2733_v13  ;;  %v1407_v13 = vld [vmem:[%s4415_s2 + $0x200] sm:$0xff] }
 0x2e3   :  { %1328 = vperm.xlu1 %2686, %v1283_v49   ;;  %2613 = vmatpush3.bf16.msra.mxu0 %v2612_v24  ;;  %v2695_v49 = vld [vmem:[%s4413_s0 + $0x40] sm:$0xff] }
 0x2e4   :  { %2647 = vmatprep.subr.bf16.mxu0 %v2646_v34  ;;  %v2652_v34 = vpack.c.bf16 %v1410_v32, %v1409_v31 }
 0x358   :  { %v4224_v38 = vpop.permute.xlu1 %1286  ;;  %v4226_v39 = vpop.permute.xlu0 %1312 }
 0x359   :  { %v1315_v40 = vmul.f32 %v4226_v39, %v3614_v28  ;;  %v1317_v41 = vmul.f32 %v4226_v39, %v3619_v30  ;;  %v1289_v45 = vmul.f32 %v2692_v43, %v4224_v38  ;;  %v1291_v47 = vmul.f32 %v2693_v46, %v4224_v38  ;;  %v2694_v28 = vld [vmem:[%s4413_s0 + $0x30] sm:$0xff]  ;;  %v1412_v43 = vld [vmem:[%s4415_s2 + $0x228] sm:$0xff]  ;;  %v1430_v46 = vld [vmem:[%s4415_s2 + $0x2b8] sm:$0xff] }
 0x35a   :  { %v1290_v52 = vmul.f32 %v2696_v51, %v4224_v38  ;;  %v1292_v55 = vmul.f32 %v2698_v35, %v4224_v38  ;;  %v1294_v59 = vmul.f32 %v2700_v58, %v4224_v38  ;;  %v1316_v0 = vmul.f32 %v2702_v63, %v4226_v39  ;;  %v1432_v51 = vld [vmem:[%s4415_s2 + $0x2c8] sm:$0xff] }
 0x35b   :  { %v1318_v7 = vmul.f32 %v2703_v5, %v4226_v39  ;;  %v1320_v15 = vmul.f32 %v4226_v39, %v3649_v42  ;;  %v1416_v35 = vld [vmem:[%s4415_s2 + $0x248] sm:$0xff] }
 0x35c   :  { %v1420_v5 = vld [vmem:[%s4415_s2 + $0x268] sm:$0xff] }
 0x35d   :  { %v4240_v48 = vpop.permute.xlu1 %1296 }
 0x35e   :  { %v1299_v30 = vmul.f32 %v2694_v28, %v4240_v48  ;;  %v1301_v50 = vmul.f32 %v2695_v49, %v4240_v48  ;;  %v1300_v54 = vmul.f32 %v2697_v53, %v4240_v48  ;;  %v1302_v57 = vmul.f32 %v2699_v56, %v4240_v48  ;;  %v1414_v49 = vld [vmem:[%s4415_s2 + $0x238] sm:$0xff] }
 0x35f   :  { %v1304_v61 = vmul.f32 %v2701_v60, %v4240_v48  ;;  %v1434_v56 = vld [vmem:[%s4415_s2 + $0x2d8] sm:$0xff] }
 0x360   :  { %v1306_v62 = vadd.f32 %v1300_v54, %v1290_v52  ;;  %v1305_v1 = vadd.f32 %v1299_v30, %v1289_v45  ;;  %v1307_v2 = vadd.f32 %v1301_v50, %v1291_v47  ;;  %v1308_v3 = vadd.f32 %v1302_v57, %v1292_v55  ;;  %v1429_v45 = vld [vmem:[%s4415_s2 + $0x2b0] sm:$0xff]  ;;  %v1431_v50 = vld [vmem:[%s4415_s2 + $0x2c0] sm:$0xff]  ;;  %v1418_v60 = vld [vmem:[%s4415_s2 + $0x258] sm:$0xff] }
 0x361   :  { %v1310_v8 = vadd.f32 %v1304_v61, %v1294_v59  ;;  %v2658_v28 = vpack.c.bf16 %v1430_v46, %v1429_v45  ;;  %v1413_v30 = vld [vmem:[%s4415_s2 + $0x230] sm:$0xff]  ;;  %v2662_v53 = vpack.c.bf16 %v1432_v51, %v1431_v50  ;;  %v1415_v54 = vld [vmem:[%s4415_s2 + $0x240] sm:$0xff] }
 0x362   :  { %v4282_v9 = vpop.permute.xlu1 %1328  ;;  %v1322_v10 = vadd.f32 %v1316_v0, %v1306_v62  ;;  %v1321_v11 = vadd.f32 %v1315_v40, %v1305_v1  ;;  %v1323_v12 = vadd.f32 %v1317_v41, %v1307_v2  ;;  %v1324_v23 = vadd.f32 %v1318_v7, %v1308_v3  ;;  %v1411_v41 = vld [vmem:[%s4415_s2 + $0x220] sm:$0xff]  ;;  %v1433_v55 = vld [vmem:[%s4415_s2 + $0x2d0] sm:$0xff]  ;;  %v1436_v62 = vld [vmem:[%s4415_s2 + $0x2e8] sm:$0xff] }
 0x363   :  { %v1331_v16 = vmul.f32 %v4282_v9, %v3835_v6  ;;  %v1333_v17 = vmul.f32 %v4282_v9, %v4010_v36  ;;  %v1332_v19 = vmul.f32 %v4282_v9, %v3655_v44  ;;  %v1334_v42 = vmul.f32 %v4282_v9, %v3865_v18  ;;  %v1427_v18 = vld [vmem:[%s4415_s2 + $0x2a0] sm:$0xff]  ;;  %v1417_v59 = vld [vmem:[%s4415_s2 + $0x250] sm:$0xff] }
 0x364   :  { %v1326_v24 = vadd.f32 %v1320_v15, %v1310_v8  ;;  %v1336_v6 = vmul.f32 %v4282_v9, %v3871_v20  ;;  %v2648_v44 = vpack.c.bf16 %v1408_v14, %v1407_v13  ;;  %v1428_v20 = vld [vmem:[%s4415_s2 + $0x2a8] sm:$0xff]  ;;  %v2656_v47 = vpack.c.bf16 %v1412_v43, %v1411_v41  ;;  %v1435_v61 = vld [vmem:[%s4415_s2 + $0x2e0] sm:$0xff]  ;;  %v2704_v0 = vld [vmem:[%s4413_s0 + $0x50] sm:$0xff] }
 0x365   :  { %v1338_v36 = vadd.f32 %v1332_v19, %v1322_v10  ;;  %v1337_v25 = vadd.f32 %v1331_v16, %v1321_v11  ;;  %v1339_v26 = vadd.f32 %v1333_v17, %v1323_v12  ;;  %v1340_v27 = vadd.f32 %v1334_v42, %v1324_v23  ;;  %v1419_v3 = vld [vmem:[%s4415_s2 + $0x260] sm:$0xff]  ;;  %v1437_v7 = vld [vmem:[%s4415_s2 + $0x2f0] sm:$0xff]  ;;  %v1438_v8 = vld [vmem:[%s4415_s2 + $0x2f8] sm:$0xff] }
 0x366   :  { %v1342_v33 = vadd.f32 %v1336_v6, %v1326_v24  ;;  %v2654_v40 = vpack.c.bf16 %v1428_v20, %v1427_v18  ;;  %v2660_v52 = vpack.c.bf16 %v1414_v49, %v1413_v30  ;;  %v2664_v57 = vpack.c.bf16 %v1416_v35, %v1415_v54  ;;  %v1421_v13 = vld [vmem:[%s4415_s2 + $0x270] sm:$0xff]  ;;  %v1422_v14 = vld [vmem:[%s4415_s2 + $0x278] sm:$0xff]  ;;  %v1672_v42 = vld [vmem:[%s4416_s3] ss:$0 sm:$0xff]  ;;  %s2734_s2 = smov [#allocation3]  }
 0x367   :  { %1510 = vmatprep.mubr.f32.mxu0 %v1338_v36  ;;  %1580 = vmatprep.mubr.f32.mxu1 %v1340_v27  ;;  %v2666_v58 = vpack.c.bf16 %v1434_v56, %v1433_v55  ;;  %v2668_v63 = vpack.c.bf16 %v1418_v60, %v1417_v59  ;;  %v1303_v1 = vmul.f32 %v2704_v0, %v4240_v48  ;;  %v2705_v48 = vld [vmem:[%s4413_s0 + $0x20] sm:$0xff]  ;;  %s1664_s14 = sshll.u32 %s2734_s2, 4  ;;  %s1665_s14 = int_to_ptr.vmem [resolvable:$true] %s1664_s14 }
 0x368   :  { %1511 = vmatmul.mubr.f32.vlgmr.msra.gmra.mrb[12].mxu0 %v1337_v25  ;;  %1581 = vmatmul.mubr.f32.vlgmr.msra.gmra.mrb[12].mxu1 %v1339_v26  ;;  %v2670_v2 = vpack.c.bf16 %v1436_v62, %v1435_v61  ;;  %v1293_v10 = vmul.f32 %v2705_v48, %v4224_v38  ;;  %v2672_v11 = vpack.c.bf16 %v1420_v5, %v1419_v3  ;;  %s2706_s15 = scalar_lea.vmem %s1665_s14, 128  ;;  %p2711_p1 = scmp.lt.s32.totalorder %s1665_s14, %s1665_s14 }
 0x369   :  { %2649 = vmatpush3.bf16.msra.mxu0 %v2648_v44  ;;  %1650 = vmatprep.mubr.f32.mxu0 %v1342_v33  ;;  %v2674_v12 = vpack.c.bf16 %v1438_v8, %v1437_v7  ;;  %v1319_v16 = vmul.f32 %v4226_v39, %v3830_v4  ;;  %v2676_v17 = vpack.c.bf16 %v1422_v14, %v1421_v13  ;;  %p2707_p0 = scmp.ne.s32.totalorder %s1665_s14, %s2706_s15  ;;  %p2712_p2 = scmp.lt.s32.totalorder %s2706_s15, %s2706_s15 }
 0x36a   :  { %2651 = vmatprep.subr.bf16.mxu0 %v2650_v29  ;;  %v1309_v15 = vadd.f32 %v1303_v1, %v1293_v10  ;;  %v1335_v38 = vmul.f32 %v4282_v9, %v4015_v37 }
 0x36b   :  { %p2713_p3 = por %p2712_p2, %p2711_p1 }
 0x36c   :  { %v1325_v19 = vadd.f32 %v1319_v16, %v1309_v15 }
 0x36d   :  { %2653 = vmatpush3.bf16.msra.mxu0 %v2652_v34  ;;  %p2714_p4 = pnand %p2713_p3, %p2707_p0 }
 0x36e   :  { %2655 = vmatprep.subr.bf16.mxu0 %v2654_v40  ;;  %v1341_v21 = vadd.f32 %v1335_v38, %v1325_v19 }
 0x371   :  { %2657 = vmatpush3.bf16.msra.mxu0 %v2656_v47 }
 0x372   :  { %2659 = vmatprep.subr.bf16.mxu0 %v2658_v28 }
 0x375   :  { %2661 = vmatpush3.bf16.msra.mxu0 %v2660_v52 }
 0x376   :  { %2663 = vmatprep.subr.bf16.mxu0 %v2662_v53 }
 0x379   :  { %2665 = vmatpush3.bf16.msra.mxu0 %v2664_v57 }
 0x37a   :  { %2667 = vmatprep.subr.bf16.mxu0 %v2666_v58 }
 0x37d   :  { %2669 = vmatpush3.bf16.msra.mxu0 %v2668_v63 }
 0x37e   :  { %2671 = vmatprep.subr.bf16.mxu0 %v2670_v2 }
 0x381   :  { %2673 = vmatpush3.bf16.msra.mxu0 %v2672_v11 }
 0x382   :  { %2675 = vmatprep.subr.bf16.mxu0 %v2674_v12 }
 0x385   :  { %2677 = vmatpush3.bf16.msra.mxu0 %v2676_v17 }
 0x388   :  { %1651 = vmatmul.mubr.f32.vlgmr.msra.gmra.mrb[14].mxu0 %v1341_v21 }
 0x43b   :  { %v2125_v22 = vpop.f32.mrb[12].mxu0  ;;  %v2160_v23 = vpop.f32.mrb[12].mxu1 }
 0x43c   :  { %v2126_v24 = vpop.f32.mrb[13].mxu0  ;;  %v2161_v36 = vpop.f32.mrb[13].mxu1 }
 0x43d   :  { %v2127_v6 = vadd.f32 %v2126_v24, %v2125_v22  ;;  %v2162_v4 = vadd.f32 %v2161_v36, %v2160_v23 }
 0x43f   :  { %v1513_v39 = vadd.f32 %v2127_v6, %v1672_v42 }
 0x441   :  { %v1583_v25 = vadd.f32 %v2162_v4, %v1513_v39 }
 0x45b   :  { %v2195_v26 = vpop.f32.mrb[14].mxu0 }
 0x45c   :  { %v2196_v44 = vpop.f32.mrb[15].mxu0 }
 0x45d   :  { %v2197_v37 = vadd.f32 %v2196_v44, %v2195_v26 }
 0x45f   :  { %v1653_v9 = vadd.f32 %v2197_v37, %v1583_v25 }
 0x461   :  { %1657 = vst.msk [vmem:[#allocation3] sm:$0xff] %vm1656_vm1, %v1653_v9 }
 0x462   :  { %2717 = shalt.err (!%p2714_p4)
}
 0x463   :  { %s2718_s17 = scalar_lea.hbm %s4418_s5, 128 }
 0x464   :  { %p2719_p5 = scmp.ne.s32.totalorder %s4418_s5, %s2718_s17  ;;  %p2722_p6 = scmp.lt.u32.totalorder %s2718_s17, %s4418_s5 }
 0x466   :  { %p2724_p7 = pnand %p2722_p6, %p2719_p5 }
 0x468   :  { %2727 = shalt.err (!%p2724_p7)
}
 0x469   :  { %1667 = dma.vmem_to_hbm [thread:$0]  %s1665_s14, 128, %s4418_s5, [#allocation4]  }
 0x46a   :  { %2728 = dma.done.wait [#allocation4], 128  }
 0x46b   :  { %2729 = vsyncadd [#allocation4], 4294967168 }
 0x46c   :  { %1671 = vsyncpa [#allocation4], 1 }

</bundles_post_ra>
